<compile_context>
chip_gen: v7x
topology: tpu7x:2x2x1
jax: 0.10.0
libtpu: 0.0.40
codegen_flags: <defaults>
</compile_context>

<pallas_src>
import jax
import jax.numpy as jnp
from jax.experimental import pallas as pl
from jax.experimental.pallas import tpu as pltpu

# Small, module-consistent demo configuration (PyTorch defaults were 200/512/8/4/9).
INPUT_DIM = 32
HIDDEN_DIM = 128          # lane-dense (multiple of 128)
NUM_LAYERS = 4
SKIP_INTERVAL = 2
NUM_CLASSES = 9
OUT_PAD = 128             # lane-dense padded output width
LN_EPS = 1e-5             # torch.nn.LayerNorm default eps

N_SKIPS = sum(1 for i in range(NUM_LAYERS) if (i + 1) % SKIP_INTERVAL == 0)
N_XSLABS = 1 + N_SKIPS    # input layer + one x-projection per skip layer


def _is_skip(i):
    return (i + 1) % SKIP_INTERVAL == 0


def _round_up(n, m):
    return ((n + m - 1) // m) * m


def _layernorm_onepass(z, gamma, beta):
    # One-pass biased-variance LayerNorm (matches torch semantics).
    inv_h = 1.0 / z.shape[-1]
    mean = jnp.sum(z, axis=-1, keepdims=True) * inv_h
    meansq = jnp.sum(z * z, axis=-1, keepdims=True) * inv_h
    var = meansq - mean * mean
    return (z - mean) * (jax.lax.rsqrt(var + LN_EPS) * gamma) + beta


# ----------------------------------------------------------------------------
# Kernel
# ----------------------------------------------------------------------------
def xas_kernel(x_ref, wx_ref, wh_ref, vec_ref, wout_ref, bout_ref, o_ref):
    H = HIDDEN_DIM
    x_in = x_ref[...]                                    # (bb, INPUT_DIM) f32

    # All x-projections (input layer + skip layers) in ONE MXU pass.
    xz_all = jnp.dot(x_in, wx_ref[...],                  # (bb, N_XSLABS*H)
                     preferred_element_type=jnp.float32)

    # input_layer + ReLU
    h = jnp.maximum(xz_all[:, :H] + vec_ref[0:1, :], 0.0)

    # hidden stack: (split-skip) Linear -> LayerNorm -> ReLU
    skip_idx = 1
    for i in range(NUM_LAYERS):
        b = vec_ref[1 + 3 * i: 2 + 3 * i, :]
        gamma = vec_ref[2 + 3 * i: 3 + 3 * i, :]
        beta = vec_ref[3 + 3 * i: 4 + 3 * i, :]

        z = jnp.dot(h, wh_ref[i], preferred_element_type=jnp.float32) + b
        if _is_skip(i):   # == cat([h, x_input], -1) @ W_full
            z = z + xz_all[:, skip_idx * H:(skip_idx + 1) * H]
            skip_idx += 1
        h = jnp.maximum(_layernorm_onepass(z, gamma, beta), 0.0)

    # output_layer (lane-dense padded to OUT_PAD columns, no activation)
    out = jnp.dot(h, wout_ref[...], preferred_element_type=jnp.float32) + bout_ref[...]
    o_ref[...] = out.astype(o_ref.dtype)


# ----------------------------------------------------------------------------
# Parameters
# ----------------------------------------------------------------------------
def init_params(key):
    """nn.Linear-style init; returns a 'logical' (unpacked) parameter dict."""
    keys = iter(jax.random.split(key, 4 * (NUM_LAYERS + 2)))

    def linear(fan_in, fan_out):
        bound = 1.0 / (fan_in ** 0.5)
        w = jax.random.uniform(next(keys), (fan_in, fan_out), jnp.float32, -bound, bound)
        b = jax.random.uniform(next(keys), (fan_out,), jnp.float32, -bound, bound)
        return w, b

    params = {}
    params["w_in"], params["b_in"] = linear(INPUT_DIM, HIDDEN_DIM)
    params["hidden"] = []
    for i in range(NUM_LAYERS):
        fan_in = HIDDEN_DIM + INPUT_DIM if _is_skip(i) else HIDDEN_DIM
        w, b = linear(fan_in, HIDDEN_DIM)
        # non-trivial LN affine params to make the correctness check meaningful
        gamma = 1.0 + 0.1 * jax.random.uniform(next(keys), (HIDDEN_DIM,), jnp.float32)
        beta = 0.1 * jax.random.uniform(next(keys), (HIDDEN_DIM,), jnp.float32)
        params["hidden"].append((w, b, gamma, beta))
    params["w_out"], params["b_out"] = linear(HIDDEN_DIM, NUM_CLASSES)
    return params


def pack_params(params):
    """Pack logical params into the few dense operands the kernel consumes."""
    wx = [params["w_in"]]                      # slab 0 = input layer weight
    wh = []
    vec_rows = [params["b_in"]]
    for i in range(NUM_LAYERS):
        w, b, gamma, beta = params["hidden"][i]
        if _is_skip(i):
            wh.append(w[:HIDDEN_DIM])          # rows multiplying h (cat order [h, x])
            wx.append(w[HIDDEN_DIM:])          # rows multiplying x_input
        else:
            wh.append(w)
        vec_rows += [b, gamma, beta]

    wx_all = jnp.concatenate(wx, axis=1)       # (INPUT_DIM, N_XSLABS*HIDDEN_DIM)
    wh_stack = jnp.stack(wh)                   # (NUM_LAYERS, HIDDEN_DIM, HIDDEN_DIM)
    vec_stack = jnp.stack(vec_rows)            # (1+3*NUM_LAYERS, HIDDEN_DIM)

    w_out_pad = jnp.zeros((HIDDEN_DIM, OUT_PAD), jnp.float32)
    w_out_pad = w_out_pad.at[:, :NUM_CLASSES].set(params["w_out"])
    b_out_pad = jnp.zeros((1, OUT_PAD), jnp.float32)
    b_out_pad = b_out_pad.at[0, :NUM_CLASSES].set(params["b_out"])
    return wx_all, wh_stack, vec_stack, w_out_pad, b_out_pad


# ----------------------------------------------------------------------------
# Wrapper
# ----------------------------------------------------------------------------
def xas_classifier_forward(x, packed, *, block_batch=1024):
    wx_all, wh_stack, vec_stack, w_out_pad, b_out_pad = packed
    B, D = x.shape
    assert D == INPUT_DIM

    # Large batch tile (multiple of 8 for f32 sublanes), clamped to batch size;
    # pad the batch so the 1-D grid divides evenly.
    bb = max(8, min(_round_up(block_batch, 8), _round_up(B, 8)))
    B_pad = _round_up(B, bb)
    if B_pad != B:
        x = jnp.pad(x, ((0, B_pad - B), (0, 0)))
    grid = (B_pad // bb,)

    # Advisory cost estimate for XLA's scheduler.
    flops_per_row = 2 * (INPUT_DIM * N_XSLABS * HIDDEN_DIM
                         + NUM_LAYERS * HIDDEN_DIM * HIDDEN_DIM
                         + HIDDEN_DIM * OUT_PAD)
    param_bytes = sum(int(p.size) * p.dtype.itemsize for p in packed)
    cost = pl.CostEstimate(
        flops=B_pad * flops_per_row,
        transcendentals=B_pad * NUM_LAYERS,           # one rsqrt per row per LayerNorm
        bytes_accessed=B_pad * (INPUT_DIM + OUT_PAD) * 4 + param_bytes,
    )

    out = pl.pallas_call(
        xas_kernel,
        out_shape=jax.ShapeDtypeStruct((B_pad, OUT_PAD), jnp.float32),
        grid_spec=pltpu.PrefetchScalarGridSpec(
            num_scalar_prefetch=0,
            grid=grid,
            in_specs=[
                pl.BlockSpec((bb, INPUT_DIM), lambda i: (i, 0)),
                pl.BlockSpec(wx_all.shape, lambda i: (0, 0)),
                pl.BlockSpec(wh_stack.shape, lambda i: (0, 0, 0)),
                pl.BlockSpec(vec_stack.shape, lambda i: (0, 0)),
                pl.BlockSpec(w_out_pad.shape, lambda i: (0, 0)),
                pl.BlockSpec(b_out_pad.shape, lambda i: (0, 0)),
            ],
            out_specs=pl.BlockSpec((bb, OUT_PAD), lambda i: (i, 0)),
        ),
        compiler_params=pltpu.CompilerParams(
            dimension_semantics=("parallel",),
        ),
        cost_estimate=cost,
    )(x, wx_all, wh_stack, vec_stack, w_out_pad, b_out_pad)

    return out[:B, :NUM_CLASSES]


# ----------------------------------------------------------------------------
# Pure-JAX reference (mirrors the PyTorch module, including the real concat and
# a standard two-pass LayerNorm, independent of the kernel's one-pass formula).
# ----------------------------------------------------------------------------
def reference_forward(x, params):
    def ln(z, gamma, beta):
        mean = jnp.mean(z, axis=-1, keepdims=True)
        var = jnp.var(z, axis=-1, keepdims=True)
        return (z - mean) * jax.lax.rsqrt(var + LN_EPS) * gamma + beta

    h = jax.nn.relu(x @ params["w_in"] + params["b_in"])
    for i in range(NUM_LAYERS):
        w, b, gamma, beta = params["hidden"][i]
        inp = jnp.concatenate([h, x], axis=-1) if _is_skip(i) else h
        z = inp @ w + b
        h = jax.nn.relu(ln(z, gamma, beta))
    return h @ params["w_out"] + params["b_out"]


if __name__ == "__main__":
    key = jax.random.PRNGKey(0)
    kx, kp = jax.random.split(key)

    B = 200  # not a multiple of the block -> exercises the pad/slice path
    x = jax.random.normal(kx, (B, INPUT_DIM), jnp.float32)
    params = init_params(kp)
    packed = pack_params(params)

    # block_batch=128 keeps the demo small while giving a 2-step grid;
    # production default is 1024 rows per block.
    out = xas_classifier_forward(x, packed, block_batch=128)
    out = jax.block_until_ready(out)

    ref = reference_forward(x, params)
    assert out.shape == (B, NUM_CLASSES)
    assert jnp.allclose(out, ref, atol=1e-3, rtol=1e-3), "mismatch vs reference"

    print("KERNEL_OK")
</pallas_src>

<mosaic_0001>
module attributes {stable_mosaic.version = 11 : i64} {
  func.func @xas_kernel(%arg0: i32, %arg1: memref<128x32xf32, #tpu.memory_space<vmem>>, %arg2: memref<32x384xf32, #tpu.memory_space<vmem>>, %arg3: memref<4x128x128xf32, #tpu.memory_space<vmem>>, %arg4: memref<13x128xf32, #tpu.memory_space<vmem>>, %arg5: memref<128x128xf32, #tpu.memory_space<vmem>>, %arg6: memref<1x128xf32, #tpu.memory_space<vmem>>, %arg7: memref<128x128xf32, #tpu.memory_space<vmem>>) attributes {dimension_semantics = [#tpu.dimension_semantics<parallel>], iteration_bounds = array<i64: 2>, scalar_prefetch = 0 : i64, scratch_operands = 0 : i64, tpu.core_type = #tpu.core_type<tc>, window_params = [{transform_indices = @transform_0, window_bounds = array<i64: 128, 32>}, {pipeline_mode = #tpu.pipeline_mode<synchronous>, transform_indices = @transform_1, window_bounds = array<i64: 32, 384>}, {pipeline_mode = #tpu.pipeline_mode<synchronous>, transform_indices = @transform_2, window_bounds = array<i64: 4, 128, 128>}, {pipeline_mode = #tpu.pipeline_mode<synchronous>, transform_indices = @transform_3, window_bounds = array<i64: 13, 128>}, {pipeline_mode = #tpu.pipeline_mode<synchronous>, transform_indices = @transform_4, window_bounds = array<i64: 128, 128>}, {pipeline_mode = #tpu.pipeline_mode<synchronous>, transform_indices = @transform_5, window_bounds = array<i64: 1, 128>}, {transform_indices = @transform_6, window_bounds = array<i64: 128, 128>}]} {
    %c0 = arith.constant 0 : index
    %c0_0 = arith.constant 0 : index
    %0 = vector.load %arg1[%c0, %c0_0] : memref<128x32xf32, #tpu.memory_space<vmem>>, vector<128x32xf32>
    %c0_1 = arith.constant 0 : index
    %c0_2 = arith.constant 0 : index
    %1 = vector.load %arg2[%c0_1, %c0_2] : memref<32x384xf32, #tpu.memory_space<vmem>>, vector<32x384xf32>
    %cst = arith.constant dense<0.000000e+00> : vector<128x384xf32>
    %2 = tpu.matmul %0, %1, %cst {dimension_numbers = #tpu.dot_dimension_numbers<[1], [0], [0], [1], [0, 0, 1, 1], [], []>} : vector<128x32xf32>, vector<32x384xf32>, vector<128x384xf32> -> vector<128x384xf32>
    %3 = vector.extract_strided_slice %2 {offsets = [0, 0], sizes = [128, 128], strides = [1, 1]} : vector<128x384xf32> to vector<128x128xf32>
    %c0_3 = arith.constant 0 : index
    %c0_4 = arith.constant 0 : index
    %4 = vector.load %arg4[%c0_3, %c0_4] : memref<13x128xf32, #tpu.memory_space<vmem>>, vector<1x128xf32>
    %5 = vector.broadcast %4 : vector<1x128xf32> to vector<128x128xf32>
    %6 = arith.addf %3, %5 : vector<128x128xf32>
    %cst_5 = arith.constant 0.000000e+00 : f32
    %7 = vector.broadcast %cst_5 : f32 to vector<128x128xf32>
    %8 = arith.maximumf %6, %7 : vector<128x128xf32>
    %c1 = arith.constant 1 : index
    %c0_6 = arith.constant 0 : index
    %9 = vector.load %arg4[%c1, %c0_6] : memref<13x128xf32, #tpu.memory_space<vmem>>, vector<1x128xf32>
    %c2 = arith.constant 2 : index
    %c0_7 = arith.constant 0 : index
    %10 = vector.load %arg4[%c2, %c0_7] : memref<13x128xf32, #tpu.memory_space<vmem>>, vector<1x128xf32>
    %c3 = arith.constant 3 : index
    %c0_8 = arith.constant 0 : index
    %11 = vector.load %arg4[%c3, %c0_8] : memref<13x128xf32, #tpu.memory_space<vmem>>, vector<1x128xf32>
    %c0_9 = arith.constant 0 : index
    %c0_10 = arith.constant 0 : index
    %c0_11 = arith.constant 0 : index
    %12 = vector.load %arg3[%c0_9, %c0_10, %c0_11] : memref<4x128x128xf32, #tpu.memory_space<vmem>>, vector<1x128x128xf32>
    %13 = vector.shape_cast %12 : vector<1x128x128xf32> to vector<128x128xf32>
    %cst_12 = arith.constant dense<0.000000e+00> : vector<128x128xf32>
    %14 = tpu.matmul %8, %13, %cst_12 {dimension_numbers = #tpu.dot_dimension_numbers<[1], [0], [0], [1], [0, 0, 1, 1], [], []>} : vector<128x128xf32>, vector<128x128xf32>, vector<128x128xf32> -> vector<128x128xf32>
    %15 = vector.broadcast %9 : vector<1x128xf32> to vector<128x128xf32>
    %16 = arith.addf %14, %15 : vector<128x128xf32>
    %cst_13 = arith.constant dense<0.000000e+00> : vector<128xf32>
    %17 = vector.multi_reduction <add>, %16, %cst_13 [1] : vector<128x128xf32> to vector<128xf32>
    %18 = vector.shape_cast %17 : vector<128xf32> to vector<128x1xf32>
    %cst_14 = arith.constant 7.812500e-03 : f32
    %19 = vector.broadcast %cst_14 : f32 to vector<128x1xf32>
    %20 = arith.mulf %18, %19 : vector<128x1xf32>
    %21 = arith.mulf %16, %16 : vector<128x128xf32>
    %cst_15 = arith.constant dense<0.000000e+00> : vector<128xf32>
    %22 = vector.multi_reduction <add>, %21, %cst_15 [1] : vector<128x128xf32> to vector<128xf32>
    %23 = vector.shape_cast %22 : vector<128xf32> to vector<128x1xf32>
    %cst_16 = arith.constant 7.812500e-03 : f32
    %24 = vector.broadcast %cst_16 : f32 to vector<128x1xf32>
    %25 = arith.mulf %23, %24 : vector<128x1xf32>
    %26 = arith.mulf %20, %20 : vector<128x1xf32>
    %27 = arith.subf %25, %26 : vector<128x1xf32>
    %28 = vector.broadcast %20 : vector<128x1xf32> to vector<128x128xf32>
    %29 = arith.subf %16, %28 : vector<128x128xf32>
    %cst_17 = arith.constant 9.99999974E-6 : f32
    %30 = vector.broadcast %cst_17 : f32 to vector<128x1xf32>
    %31 = arith.addf %27, %30 : vector<128x1xf32>
    %32 = math.rsqrt %31 : vector<128x1xf32>
    %33 = vector.broadcast %32 : vector<128x1xf32> to vector<128x128xf32>
    %34 = vector.broadcast %10 : vector<1x128xf32> to vector<128x128xf32>
    %35 = arith.mulf %33, %34 : vector<128x128xf32>
    %36 = arith.mulf %29, %35 : vector<128x128xf32>
    %37 = vector.broadcast %11 : vector<1x128xf32> to vector<128x128xf32>
    %38 = arith.addf %36, %37 : vector<128x128xf32>
    %cst_18 = arith.constant 0.000000e+00 : f32
    %39 = vector.broadcast %cst_18 : f32 to vector<128x128xf32>
    %40 = arith.maximumf %38, %39 : vector<128x128xf32>
    %c4 = arith.constant 4 : index
    %c0_19 = arith.constant 0 : index
    %41 = vector.load %arg4[%c4, %c0_19] : memref<13x128xf32, #tpu.memory_space<vmem>>, vector<1x128xf32>
    %c5 = arith.constant 5 : index
    %c0_20 = arith.constant 0 : index
    %42 = vector.load %arg4[%c5, %c0_20] : memref<13x128xf32, #tpu.memory_space<vmem>>, vector<1x128xf32>
    %c6 = arith.constant 6 : index
    %c0_21 = arith.constant 0 : index
    %43 = vector.load %arg4[%c6, %c0_21] : memref<13x128xf32, #tpu.memory_space<vmem>>, vector<1x128xf32>
    %c1_22 = arith.constant 1 : index
    %c0_23 = arith.constant 0 : index
    %c0_24 = arith.constant 0 : index
    %44 = vector.load %arg3[%c1_22, %c0_23, %c0_24] : memref<4x128x128xf32, #tpu.memory_space<vmem>>, vector<1x128x128xf32>
    %45 = vector.shape_cast %44 : vector<1x128x128xf32> to vector<128x128xf32>
    %cst_25 = arith.constant dense<0.000000e+00> : vector<128x128xf32>
    %46 = tpu.matmul %40, %45, %cst_25 {dimension_numbers = #tpu.dot_dimension_numbers<[1], [0], [0], [1], [0, 0, 1, 1], [], []>} : vector<128x128xf32>, vector<128x128xf32>, vector<128x128xf32> -> vector<128x128xf32>
    %47 = vector.broadcast %41 : vector<1x128xf32> to vector<128x128xf32>
    %48 = arith.addf %46, %47 : vector<128x128xf32>
    %49 = vector.extract_strided_slice %2 {offsets = [0, 128], sizes = [128, 128], strides = [1, 1]} : vector<128x384xf32> to vector<128x128xf32>
    %50 = arith.addf %48, %49 : vector<128x128xf32>
    %cst_26 = arith.constant dense<0.000000e+00> : vector<128xf32>
    %51 = vector.multi_reduction <add>, %50, %cst_26 [1] : vector<128x128xf32> to vector<128xf32>
    %52 = vector.shape_cast %51 : vector<128xf32> to vector<128x1xf32>
    %cst_27 = arith.constant 7.812500e-03 : f32
    %53 = vector.broadcast %cst_27 : f32 to vector<128x1xf32>
    %54 = arith.mulf %52, %53 : vector<128x1xf32>
    %55 = arith.mulf %50, %50 : vector<128x128xf32>
    %cst_28 = arith.constant dense<0.000000e+00> : vector<128xf32>
    %56 = vector.multi_reduction <add>, %55, %cst_28 [1] : vector<128x128xf32> to vector<128xf32>
    %57 = vector.shape_cast %56 : vector<128xf32> to vector<128x1xf32>
    %cst_29 = arith.constant 7.812500e-03 : f32
    %58 = vector.broadcast %cst_29 : f32 to vector<128x1xf32>
    %59 = arith.mulf %57, %58 : vector<128x1xf32>
    %60 = arith.mulf %54, %54 : vector<128x1xf32>
    %61 = arith.subf %59, %60 : vector<128x1xf32>
    %62 = vector.broadcast %54 : vector<128x1xf32> to vector<128x128xf32>
    %63 = arith.subf %50, %62 : vector<128x128xf32>
    %cst_30 = arith.constant 9.99999974E-6 : f32
    %64 = vector.broadcast %cst_30 : f32 to vector<128x1xf32>
    %65 = arith.addf %61, %64 : vector<128x1xf32>
    %66 = math.rsqrt %65 : vector<128x1xf32>
    %67 = vector.broadcast %66 : vector<128x1xf32> to vector<128x128xf32>
    %68 = vector.broadcast %42 : vector<1x128xf32> to vector<128x128xf32>
    %69 = arith.mulf %67, %68 : vector<128x128xf32>
    %70 = arith.mulf %63, %69 : vector<128x128xf32>
    %71 = vector.broadcast %43 : vector<1x128xf32> to vector<128x128xf32>
    %72 = arith.addf %70, %71 : vector<128x128xf32>
    %cst_31 = arith.constant 0.000000e+00 : f32
    %73 = vector.broadcast %cst_31 : f32 to vector<128x128xf32>
    %74 = arith.maximumf %72, %73 : vector<128x128xf32>
    %c7 = arith.constant 7 : index
    %c0_32 = arith.constant 0 : index
    %75 = vector.load %arg4[%c7, %c0_32] : memref<13x128xf32, #tpu.memory_space<vmem>>, vector<1x128xf32>
    %c8 = arith.constant 8 : index
    %c0_33 = arith.constant 0 : index
    %76 = vector.load %arg4[%c8, %c0_33] : memref<13x128xf32, #tpu.memory_space<vmem>>, vector<1x128xf32>
    %c9 = arith.constant 9 : index
    %c0_34 = arith.constant 0 : index
    %77 = vector.load %arg4[%c9, %c0_34] : memref<13x128xf32, #tpu.memory_space<vmem>>, vector<1x128xf32>
    %c2_35 = arith.constant 2 : index
    %c0_36 = arith.constant 0 : index
    %c0_37 = arith.constant 0 : index
    %78 = vector.load %arg3[%c2_35, %c0_36, %c0_37] : memref<4x128x128xf32, #tpu.memory_space<vmem>>, vector<1x128x128xf32>
    %79 = vector.shape_cast %78 : vector<1x128x128xf32> to vector<128x128xf32>
    %cst_38 = arith.constant dense<0.000000e+00> : vector<128x128xf32>
    %80 = tpu.matmul %74, %79, %cst_38 {dimension_numbers = #tpu.dot_dimension_numbers<[1], [0], [0], [1], [0, 0, 1, 1], [], []>} : vector<128x128xf32>, vector<128x128xf32>, vector<128x128xf32> -> vector<128x128xf32>
    %81 = vector.broadcast %75 : vector<1x128xf32> to vector<128x128xf32>
    %82 = arith.addf %80, %81 : vector<128x128xf32>
    %cst_39 = arith.constant dense<0.000000e+00> : vector<128xf32>
    %83 = vector.multi_reduction <add>, %82, %cst_39 [1] : vector<128x128xf32> to vector<128xf32>
    %84 = vector.shape_cast %83 : vector<128xf32> to vector<128x1xf32>
    %cst_40 = arith.constant 7.812500e-03 : f32
    %85 = vector.broadcast %cst_40 : f32 to vector<128x1xf32>
    %86 = arith.mulf %84, %85 : vector<128x1xf32>
    %87 = arith.mulf %82, %82 : vector<128x128xf32>
    %cst_41 = arith.constant dense<0.000000e+00> : vector<128xf32>
    %88 = vector.multi_reduction <add>, %87, %cst_41 [1] : vector<128x128xf32> to vector<128xf32>
    %89 = vector.shape_cast %88 : vector<128xf32> to vector<128x1xf32>
    %cst_42 = arith.constant 7.812500e-03 : f32
    %90 = vector.broadcast %cst_42 : f32 to vector<128x1xf32>
    %91 = arith.mulf %89, %90 : vector<128x1xf32>
    %92 = arith.mulf %86, %86 : vector<128x1xf32>
    %93 = arith.subf %91, %92 : vector<128x1xf32>
    %94 = vector.broadcast %86 : vector<128x1xf32> to vector<128x128xf32>
    %95 = arith.subf %82, %94 : vector<128x128xf32>
    %cst_43 = arith.constant 9.99999974E-6 : f32
    %96 = vector.broadcast %cst_43 : f32 to vector<128x1xf32>
    %97 = arith.addf %93, %96 : vector<128x1xf32>
    %98 = math.rsqrt %97 : vector<128x1xf32>
    %99 = vector.broadcast %98 : vector<128x1xf32> to vector<128x128xf32>
    %100 = vector.broadcast %76 : vector<1x128xf32> to vector<128x128xf32>
    %101 = arith.mulf %99, %100 : vector<128x128xf32>
    %102 = arith.mulf %95, %101 : vector<128x128xf32>
    %103 = vector.broadcast %77 : vector<1x128xf32> to vector<128x128xf32>
    %104 = arith.addf %102, %103 : vector<128x128xf32>
    %cst_44 = arith.constant 0.000000e+00 : f32
    %105 = vector.broadcast %cst_44 : f32 to vector<128x128xf32>
    %106 = arith.maximumf %104, %105 : vector<128x128xf32>
    %c10 = arith.constant 10 : index
    %c0_45 = arith.constant 0 : index
    %107 = vector.load %arg4[%c10, %c0_45] : memref<13x128xf32, #tpu.memory_space<vmem>>, vector<1x128xf32>
    %c11 = arith.constant 11 : index
    %c0_46 = arith.constant 0 : index
    %108 = vector.load %arg4[%c11, %c0_46] : memref<13x128xf32, #tpu.memory_space<vmem>>, vector<1x128xf32>
    %c12 = arith.constant 12 : index
    %c0_47 = arith.constant 0 : index
    %109 = vector.load %arg4[%c12, %c0_47] : memref<13x128xf32, #tpu.memory_space<vmem>>, vector<1x128xf32>
    %c3_48 = arith.constant 3 : index
    %c0_49 = arith.constant 0 : index
    %c0_50 = arith.constant 0 : index
    %110 = vector.load %arg3[%c3_48, %c0_49, %c0_50] : memref<4x128x128xf32, #tpu.memory_space<vmem>>, vector<1x128x128xf32>
    %111 = vector.shape_cast %110 : vector<1x128x128xf32> to vector<128x128xf32>
    %cst_51 = arith.constant dense<0.000000e+00> : vector<128x128xf32>
    %112 = tpu.matmul %106, %111, %cst_51 {dimension_numbers = #tpu.dot_dimension_numbers<[1], [0], [0], [1], [0, 0, 1, 1], [], []>} : vector<128x128xf32>, vector<128x128xf32>, vector<128x128xf32> -> vector<128x128xf32>
    %113 = vector.broadcast %107 : vector<1x128xf32> to vector<128x128xf32>
    %114 = arith.addf %112, %113 : vector<128x128xf32>
    %115 = vector.extract_strided_slice %2 {offsets = [0, 256], sizes = [128, 128], strides = [1, 1]} : vector<128x384xf32> to vector<128x128xf32>
    %116 = arith.addf %114, %115 : vector<128x128xf32>
    %cst_52 = arith.constant dense<0.000000e+00> : vector<128xf32>
    %117 = vector.multi_reduction <add>, %116, %cst_52 [1] : vector<128x128xf32> to vector<128xf32>
    %118 = vector.shape_cast %117 : vector<128xf32> to vector<128x1xf32>
    %cst_53 = arith.constant 7.812500e-03 : f32
    %119 = vector.broadcast %cst_53 : f32 to vector<128x1xf32>
    %120 = arith.mulf %118, %119 : vector<128x1xf32>
    %121 = arith.mulf %116, %116 : vector<128x128xf32>
    %cst_54 = arith.constant dense<0.000000e+00> : vector<128xf32>
    %122 = vector.multi_reduction <add>, %121, %cst_54 [1] : vector<128x128xf32> to vector<128xf32>
    %123 = vector.shape_cast %122 : vector<128xf32> to vector<128x1xf32>
    %cst_55 = arith.constant 7.812500e-03 : f32
    %124 = vector.broadcast %cst_55 : f32 to vector<128x1xf32>
    %125 = arith.mulf %123, %124 : vector<128x1xf32>
    %126 = arith.mulf %120, %120 : vector<128x1xf32>
    %127 = arith.subf %125, %126 : vector<128x1xf32>
    %128 = vector.broadcast %120 : vector<128x1xf32> to vector<128x128xf32>
    %129 = arith.subf %116, %128 : vector<128x128xf32>
    %cst_56 = arith.constant 9.99999974E-6 : f32
    %130 = vector.broadcast %cst_56 : f32 to vector<128x1xf32>
    %131 = arith.addf %127, %130 : vector<128x1xf32>
    %132 = math.rsqrt %131 : vector<128x1xf32>
    %133 = vector.broadcast %132 : vector<128x1xf32> to vector<128x128xf32>
    %134 = vector.broadcast %108 : vector<1x128xf32> to vector<128x128xf32>
    %135 = arith.mulf %133, %134 : vector<128x128xf32>
    %136 = arith.mulf %129, %135 : vector<128x128xf32>
    %137 = vector.broadcast %109 : vector<1x128xf32> to vector<128x128xf32>
    %138 = arith.addf %136, %137 : vector<128x128xf32>
    %cst_57 = arith.constant 0.000000e+00 : f32
    %139 = vector.broadcast %cst_57 : f32 to vector<128x128xf32>
    %140 = arith.maximumf %138, %139 : vector<128x128xf32>
    %c0_58 = arith.constant 0 : index
    %c0_59 = arith.constant 0 : index
    %141 = vector.load %arg5[%c0_58, %c0_59] : memref<128x128xf32, #tpu.memory_space<vmem>>, vector<128x128xf32>
    %cst_60 = arith.constant dense<0.000000e+00> : vector<128x128xf32>
    %142 = tpu.matmul %140, %141, %cst_60 {dimension_numbers = #tpu.dot_dimension_numbers<[1], [0], [0], [1], [0, 0, 1, 1], [], []>} : vector<128x128xf32>, vector<128x128xf32>, vector<128x128xf32> -> vector<128x128xf32>
    %c0_61 = arith.constant 0 : index
    %c0_62 = arith.constant 0 : index
    %143 = vector.load %arg6[%c0_61, %c0_62] : memref<1x128xf32, #tpu.memory_space<vmem>>, vector<1x128xf32>
    %144 = vector.broadcast %143 : vector<1x128xf32> to vector<128x128xf32>
    %145 = arith.addf %142, %144 : vector<128x128xf32>
    %c0_63 = arith.constant 0 : index
    %c0_64 = arith.constant 0 : index
    %146 = vector.load %arg7[%c0_63, %c0_64] : memref<128x128xf32, #tpu.memory_space<vmem>>, vector<128x128xf32>
    tpu.vector_store %arg7[%c0_63, %c0_64], %145 {strides = array<i32>} : memref<128x128xf32, #tpu.memory_space<vmem>>, vector<128x128xf32>,
    return
  }
  func.func @transform_0(%arg0: i32) -> (i32, i32) {
    %c0_i32 = arith.constant 0 : i32
    %c0_i32_0 = arith.constant 0 : i32
    return %arg0, %c0_i32 : i32, i32
  }
  func.func @transform_1(%arg0: i32) -> (i32, i32) {
    %c0_i32 = arith.constant 0 : i32
    %c0_i32_0 = arith.constant 0 : i32
    %c0_i32_1 = arith.constant 0 : i32
    return %c0_i32, %c0_i32_0 : i32, i32
  }
  func.func @transform_2(%arg0: i32) -> (i32, i32, i32) {
    %c0_i32 = arith.constant 0 : i32
    %c0_i32_0 = arith.constant 0 : i32
    %c0_i32_1 = arith.constant 0 : i32
    %c0_i32_2 = arith.constant 0 : i32
    return %c0_i32, %c0_i32_0, %c0_i32_1 : i32, i32, i32
  }
  func.func @transform_3(%arg0: i32) -> (i32, i32) {
    %c0_i32 = arith.constant 0 : i32
    %c0_i32_0 = arith.constant 0 : i32
    %c0_i32_1 = arith.constant 0 : i32
    return %c0_i32, %c0_i32_0 : i32, i32
  }
  func.func @transform_4(%arg0: i32) -> (i32, i32) {
    %c0_i32 = arith.constant 0 : i32
    %c0_i32_0 = arith.constant 0 : i32
    %c0_i32_1 = arith.constant 0 : i32
    return %c0_i32, %c0_i32_0 : i32, i32
  }
  func.func @transform_5(%arg0: i32) -> (i32, i32) {
    %c0_i32 = arith.constant 0 : i32
    %c0_i32_0 = arith.constant 0 : i32
    %c0_i32_1 = arith.constant 0 : i32
    return %c0_i32, %c0_i32_0 : i32, i32
  }
  func.func @transform_6(%arg0: i32) -> (i32, i32) {
    %c0_i32 = arith.constant 0 : i32
    %c0_i32_0 = arith.constant 0 : i32
    return %arg0, %c0_i32 : i32, i32
  }
}

</mosaic_0001>

<bundles_post_ra>
// kernel: tpu_custom_call.1
= control target key start
LH: loop header
LB: loop body
LE: loop exit
PB: predicated region body
PF: predicated region fallthrough
CT: control target
= control target key end

     0   :  { %11 = vsyncpa [#allocation3], 0  ;;  %s5063_s0 = inlined_call_operand.vmem [shape: f32[256,32], index: 0, kind: input, shape index: {}]   ;;  %s5064_s1 = inlined_call_operand.vmem [shape: f32[32,384], index: 1, kind: input, shape index: {}]   ;;  %s5065_s2 = inlined_call_operand.hbm [shape: f32[4,128,128], index: 2, kind: input, shape index: {}]   ;;  %s5066_s3 = inlined_call_operand.vmem [shape: f32[13,128], index: 3, kind: input, shape index: {}]   ;;  %s5067_s4 = inlined_call_operand.vmem [shape: f32[128,128], index: 4, kind: input, shape index: {}]   ;;  %s5068_s5 = inlined_call_operand.vmem [shape: f32[1,128], index: 5, kind: input, shape index: {}]   ;;  %s5069_s6 = inlined_call_operand.hbm [shape: f32[256,128], index: 6, kind: output, shape index: {}]  }
   0x1   :  { %12 = vsyncpa [#allocation4], 0 }
   0x2   :  { %14 = vsyncpa [#allocation4 + $0x1], 0  ;;  %s3805_s21 = smov 0   ;;  %s3807_s22 = smov 0  }
   0x3   :  { %s3809_s23 = smov 0   ;;  %s3811_s24 = smov 0  }
   0x4 LB: > { %s3826_s25 = sadd.s32 4294967295, %s3761_s24   ;;  %s2723_s26 = sadd.s32 4294967294, %s3761_s24   ;;  %s3761_s24 = sphi %s3811_s24, %s5085_s24   ;;  %s3757_s23 = sphi %s3809_s23, %s5084_s23   ;;  %s3753_s22 = sphi %s3807_s22, %s5083_s22   ;;  %s3749_s21 = sphi %s3805_s21, %s5082_s21  }
   0x5   : > { %s3830_s27 = sadd.s32 1, %s3761_s24   ;;  %s158_s28 = sadd.s32 1, %s3757_s23 }
   0x6   : > { %s155_s29 = ssub.s32 %s3761_s24, %s3830_s27  ;;  %p168_p0 = scmp.ne.s32.totalorder %s3757_s23, %s3753_s22 }
   0x7   : > { %p156_p1 = scmp.eq.s32.totalorder %s155_s29, 0  ;;  %p169_p2 = scmp.eq.s32.totalorder %s3826_s25, 1 }
   0x8   : > { %p174_p3 = scmp.ne.s32.totalorder %s3753_s22, %s3749_s21  ;;  %p175_p4 = scmp.eq.s32.totalorder %s2723_s26, 1 }
   0x9   : > { %s3841_s30 = scalar_select %p156_p1, %s3757_s23, %s158_s28  }
   0xa   : > { %p3843_p5 = por %p169_p2, %p168_p0  ;;  %p3847_p6 = por %p175_p4, %p174_p3 }
   0xb   : > { %p2724_p7 = scmp.ge.s32.totalorder %s3761_s24, 1  ;;  %p182_p8 = scmp.lt.s32.totalorder %s3761_s24, 3 }
   0xc   : > { %s5073_s7 = scalar_select %p3843_p5, 1, 0 }
   0xd   : > { %s5074_s8 = scalar_select %p3847_p6, 1, 0 }
   0xe   : > { %p5070_p9 = scmp.eq.s32.totalorder %s3826_s25, 0  ;;  %p3854_p10 = pnand %p2724_p7, %p182_p8 }
   0xf   : > { %s3763_s10 = smov [#allocation2]   ;;  %s3667_s15 = scalar_lea.hbm %s5065_s2, 8192 }
  0x10   : > { %s5075_s9 = scalar_select %p3854_p10, 1, 0 }
  0x11   : > { %s197_s11 = sshll.u32 %s3763_s10, 4  ;;  %p3490_p11 = pneg %p3854_p10  ;;  %s198_s11 = int_to_ptr.vmem [resolvable:$true] %s197_s11 }
  0x12   : > { %p3668_p13 = scmp.ne.s32.totalorder %s5065_s2, %s3667_s15  ;;  %p3674_p3 = scmp.lt.u32.totalorder %s3667_s15, %s5065_s2 }
  0x13   : > { %p3862_p12 = pnand %p5070_p9, %p3490_p11 }
  0x15   : > { %p3669_p0 = pneg %p3862_p12 }
  0x17   : > { %p3670_p1 = pnand %p3669_p0, %p3668_p13 }
  0x19   : > { %p3671_p2 = pneg %p3670_p1 }
  0x1b   : > { %p3676_p4 = pnand %p3674_p3, %p3671_p2 }
  0x1d   : > { %3679 = shalt.err (!%p3676_p4)
}
  0x1e   : > { %s3680_s20 = scalar_lea.vmem %s198_s11, 8192  ;;  %p3688_p9 = scmp.lt.s32.totalorder %s198_s11, %s198_s11 }
  0x1f   : > { %p3681_p7 = scmp.ne.s32.totalorder %s198_s11, %s3680_s20  ;;  %p3689_p6 = scmp.lt.s32.totalorder %s3680_s20, %s3680_s20 }
  0x21   : > { %p3683_p8 = pnand %p3681_p7, %p3669_p0  ;;  %p3690_p5 = por %p3689_p6, %p3688_p9 }
  0x23   : > { %p3684_p11 = pneg %p3683_p8 }
  0x25   : > { %p3691_p10 = pnand %p3690_p5, %p3684_p11 }
  0x27   : > { %3694 = shalt.err (!%p3691_p10)
}
  0x28   : > { %s3764_s26 = smov 128   ;;  %s3765_s28 = smov 8  }
  0x29   : > { %3493 = dma.hbm_to_vmem [thread:$0]  (!%p3862_p12), %s5065_s2, 8192, %s198_s11, [#allocation3], %s3764_s26, %s3764_s26, %s3765_s28  }
  0x2a   : > { %p5077_p13 = scmp.ne.s32.totalorder %s5075_s9, 0 }
  0x2b   : > { %p5078_p1 = scmp.eq.s32.totalorder (!%p5077_p13), %s3826_s25, 0 }
  0x2c   : > { %231 = sbr.rel (%p5077_p13) target bundleno = 2120 (0x848), region = 44 }
  0x33   : > { %3740 = dma.done.wait (%p5078_p1), [#allocation3], 8192   ;;  %p5079_p0 = pmov %p5078_p1 }
  0x34   : > { %s2730_s13 = sshll.u32 %s3826_s25, 4  ;;  %v3766_v0 = vmov 0.0   ;;  %v285_v1 = vld [vmem:[%s5064_s1 + $0x8] sm:$0xff]  ;;  %v288_v2 = vld [vmem:[%s5064_s1 + $0x20] sm:$0xff]  ;;  %v287_v5 = vld [vmem:[%s5064_s1 + $0x18] sm:$0xff]  ;;  %vm296_vm0 = vcmask 261120  }
  0x35   : > { %3742 = vsyncadd (%p5079_p0), [#allocation3], 4294959104  ;;  %409 = vmatprep.mubr.f32.mxu0 %v3766_v0  ;;  %p262_p5 = scmp.lt.s32.totalorder %s2730_s13, 31  ;;  %v284_v3 = vld [vmem:[%s5064_s1] sm:$0xff]  ;;  %v3276_v4 = vpack.c.bf16 %v288_v2, %v285_v1  ;;  %v291_v6 = vld [vmem:[%s5064_s1 + $0x38] sm:$0xff]  ;;  %s258_s29 = sand.u32 1, %s3753_s22  }
  0x36   : > { %v294_v7 = vld [vmem:[%s5064_s1 + $0x50] sm:$0xff]  ;;  %v3278_v8 = vpack.c.bf16 %v287_v5, %v284_v3  ;;  %v293_v11 = vld [vmem:[%s5064_s1 + $0x48] sm:$0xff]  ;;  %v292_v16 = vld [vmem:[%s5064_s1 + $0x40] sm:$0xff]  ;;  %s2729_s10 = sshll.u32 %s258_s29, 7  ;;  %s2783_s14 = sshll.u32 %s3826_s25, 11 }
  0x37   : > { %s5087_s13 = smov (!%p262_p5, %s2730_s13), 31  ;;  %v3280_v9 = vpack.c.bf16 %v294_v7, %v291_v6  ;;  %v290_v10 = vld [vmem:[%s5064_s1 + $0x30] sm:$0xff]  ;;  %3277 = vmatprep.subr.bf16.mxu0 %v3276_v4  ;;  %v289_v15 = vld [vmem:[%s5064_s1 + $0x28] sm:$0xff]  ;;  %v295_v18 = vld [vmem:[%s5064_s1 + $0x58] sm:$0xff]  ;;  %s5014_s17 = scalar_lea.hbm %s5069_s6, %s2783_s14 }
  0x38   : > { %s2731_s12 = sshll.u32 %s5087_s13, 3  ;;  %3279 = vmatpush1.bf16.msra.mxu0 %v3278_v8  ;;  %v3282_v13 = vpack.c.bf16 %v293_v11, %v290_v10  ;;  %v286_v14 = vld [vmem:[%s5064_s1 + $0x10] sm:$0xff]  ;;  %v3288_v19 = vpack.c.bf16 %v295_v18, %v292_v16  ;;  %v691_v20 = vld [vmem:[#allocation2] sm:$0xff]  ;;  %v692_v21 = vld [vmem:[#allocation2 + $0x8] sm:$0xff]  ;;  %s5022_s18 = scalar_lea.sflag [#allocation4], %s258_s29 }
  0x39   : > { %s3893_s11 = scalar_lea.vmem %s5063_s0, %s2731_s12  ;;  %3281 = vmatprep.subr.bf16.mxu0 %v3280_v9  ;;  %v3284_v17 = vpack.c.bf16 %v289_v15, %v286_v14  ;;  %v3292_v23 = vpack.c.bf16 %v692_v21, %v691_v20  ;;  %v693_v24 = vld [vmem:[#allocation2 + $0x10] sm:$0xff]  ;;  %v694_v25 = vld [vmem:[#allocation2 + $0x18] sm:$0xff]  ;;  %v695_v28 = vld [vmem:[#allocation2 + $0x20] sm:$0xff]  ;;  %s4993_s12 = scalar_lea.vmem [#allocation5], %s2729_s10 }
  0x3a   : > { %v268_v12 = vld [vmem:[%s3893_s11] sm:$0xff]  ;;  %v269_v22 = vld [vmem:[%s3893_s11 + $0x8] sm:$0xff]  ;;  %v270_v26 = vld [vmem:[%s3893_s11 + $0x10] sm:$0xff]  ;;  %v3296_v27 = vpack.c.bf16 %v694_v25, %v693_v24  ;;  %s2649_s15 = sshll.u32 %s4993_s12, 4  ;;  %p5080_p9 = scmp.ne.s32.totalorder %s5073_s7, 0  ;;  %s5016_s15 = int_to_ptr.vmem [resolvable:$true] %s2649_s15 }
  0x3b   : > { %2972 = vmatprep.mubr.msk.f32.mxu1 %vm296_vm0, %v268_v12  ;;  %3285 = vmatprep.subr.bf16.mxu1 %v3284_v17  ;;  %v696_v29 = vld [vmem:[#allocation2 + $0x28] sm:$0xff]  ;;  %v271_v30 = vld [vmem:[%s3893_s11 + $0x18] sm:$0xff]  ;;  %v697_v32 = vld [vmem:[#allocation2 + $0x30] sm:$0xff]  ;;  %s3695_s25 = scalar_lea.vmem %s5016_s15, 2048  ;;  %s3767_s19 = smov [#allocation5]  }
  0x3c   : > { %3283 = vmatpush1.bf16.msra.mxu0 %v3282_v13  ;;  %3287 = vmatpush3.bf16.msra.mxu1 %v3284_v17  ;;  %v3300_v31 = vpack.c.bf16 %v696_v29, %v695_v28  ;;  %v698_v33 = vld [vmem:[#allocation2 + $0x38] sm:$0xff]  ;;  %v272_v34 = vld [vmem:[%s3893_s11 + $0x20] sm:$0xff]  ;;  %v273_v36 = vld [vmem:[%s3893_s11 + $0x28] sm:$0xff]  ;;  %p3696_p6 = scmp.ne.s32.totalorder %s5016_s15, %s3695_s25  ;;  %s3699_s20 = sshll.u32 %s3767_s19, 4  ;;  %s3700_s20 = int_to_ptr.vmem [resolvable:$false] %s3699_s20 }
  0x3d   : > { %3289 = vmatprep.subr.bf16.mxu1 %v3288_v19  ;;  %v3304_v35 = vpack.c.bf16 %v698_v33, %v697_v32  ;;  %v699_v37 = vld [vmem:[#allocation2 + $0x40] sm:$0xff]  ;;  %v700_v38 = vld [vmem:[#allocation2 + $0x48] sm:$0xff]  ;;  %v274_v39 = vld [vmem:[%s3893_s11 + $0x30] sm:$0xff]  ;;  %s3701_s26 = scalar_lea.vmem %s3700_s20, 4096  ;;  %p3702_p2 = scmp.lt.s32.totalorder %s5016_s15, %s3700_s20 }
  0x3e   : > { %v3308_v40 = vpack.c.bf16 %v700_v38, %v699_v37  ;;  %v275_v41 = vld [vmem:[%s3893_s11 + $0x38] sm:$0xff]  ;;  %v701_v42 = vld [vmem:[#allocation2 + $0x50] sm:$0xff]  ;;  %v276_v44 = vld [vmem:[%s3893_s11 + $0x40] sm:$0xff]  ;;  %p3697_p10 = pnand %p3696_p6, %p5080_p9  ;;  %p3703_p3 = scmp.lt.s32.totalorder %s3701_s26, %s3695_s25 }
  0x3f   : > { %2732 = vmatmul.mubr.msk.f32.vlgmr.msra.gmra.mrb[0].mxu0 %vm296_vm0, %v268_v12  ;;  %v702_v43 = vld [vmem:[#allocation2 + $0x58] sm:$0xff]  ;;  %v277_v46 = vld [vmem:[%s3893_s11 + $0x48] sm:$0xff]  ;;  %v278_v47 = vld [vmem:[%s3893_s11 + $0x50] sm:$0xff] }
  0x40   : > { %415 = vmatprep.mubr.f32.mxu0 %v3766_v0  ;;  %3291 = vmatpush3.bf16.msra.mxu1 %v3288_v19  ;;  %v3312_v45 = vpack.c.bf16 %v702_v43, %v701_v42  ;;  %v279_v48 = vld [vmem:[%s3893_s11 + $0x58] sm:$0xff]  ;;  %v280_v49 = vld [vmem:[%s3893_s11 + $0x60] sm:$0xff]  ;;  %v281_v50 = vld [vmem:[%s3893_s11 + $0x68] sm:$0xff]  ;;  %p3698_p12 = pneg %p3697_p10  ;;  %p3704_p4 = por %p3703_p3, %p3702_p2 }
  0x41   : > { %3293 = vmatprep.subr.bf16.mxu1 %v3292_v23  ;;  %v282_v51 = vld [vmem:[%s3893_s11 + $0x70] sm:$0xff]  ;;  %v283_v52 = vld [vmem:[%s3893_s11 + $0x78] sm:$0xff]  ;;  %v703_v53 = vld [vmem:[#allocation2 + $0x60] sm:$0xff] }
  0x42   : > { %v704_v54 = vld [vmem:[#allocation2 + $0x68] sm:$0xff]  ;;  %v705_v56 = vld [vmem:[#allocation2 + $0x70] sm:$0xff]  ;;  %v706_v57 = vld [vmem:[#allocation2 + $0x78] sm:$0xff]  ;;  %p3705_p7 = pnand %p3704_p4, %p3698_p12 }
  0x43   : > { %2733 = vmatmul.mubr.msk.f32.gmra.mrb[2].mxu0 %vm296_vm0, %v269_v22  ;;  %2973 = vmatmul.mubr.msk.f32.vlgmr.msra.gmra.mrb[0].mxu1 %vm296_vm0, %v269_v22  ;;  %v3316_v55 = vpack.c.bf16 %v704_v54, %v703_v53  ;;  %v3320_v58 = vpack.c.bf16 %v706_v57, %v705_v56  ;;  %v3997_v59 = vld [vmem:[%s5066_s3] ss:$0 sm:$0xff] }
  0x44   : > { %421 = vmatprep.mubr.f32.mxu0 %v3766_v0  ;;  %3295 = vmatpush3.bf16.msra.mxu1 %v3292_v23 }
  0x45   : > { %2975 = vmatprep.mubr.msk.f32.mxu1 %vm296_vm0, %v270_v26  ;;  %3297 = vmatprep.subr.bf16.mxu1 %v3296_v27 }
  0x47   : > { %2734 = vmatmul.mubr.msk.f32.gmra.mrb[4].mxu0 %vm296_vm0, %v270_v26  ;;  %2976 = vmatmul.mubr.msk.f32.gmra.mrb[2].mxu1 %vm296_vm0, %v271_v30 }
  0x48   : > { %427 = vmatprep.mubr.f32.mxu0 %v3766_v0  ;;  %3299 = vmatpush3.bf16.msra.mxu1 %v3296_v27 }
  0x49   : > { %2978 = vmatprep.mubr.msk.f32.mxu1 %vm296_vm0, %v272_v34  ;;  %3301 = vmatprep.subr.bf16.mxu1 %v3300_v31 }
  0x4b   : > { %2735 = vmatmul.mubr.msk.f32.gmra.mrb[6].mxu0 %vm296_vm0, %v271_v30  ;;  %2979 = vmatmul.mubr.msk.f32.gmra.mrb[4].mxu1 %vm296_vm0, %v273_v36 }
  0x4c   : > { %433 = vmatprep.mubr.f32.mxu0 %v3766_v0  ;;  %3303 = vmatpush3.bf16.msra.mxu1 %v3300_v31 }
  0x4d   : > { %2981 = vmatprep.mubr.msk.f32.mxu1 %vm296_vm0, %v274_v39  ;;  %3305 = vmatprep.subr.bf16.mxu1 %v3304_v35 }
  0x4f   : > { %2736 = vmatmul.mubr.msk.f32.gmra.mrb[8].mxu0 %vm296_vm0, %v272_v34  ;;  %2982 = vmatmul.mubr.msk.f32.gmra.mrb[6].mxu1 %vm296_vm0, %v275_v41 }
  0x50   : > { %439 = vmatprep.mubr.f32.mxu0 %v3766_v0  ;;  %3307 = vmatpush3.bf16.msra.mxu1 %v3304_v35 }
  0x51   : > { %2984 = vmatprep.mubr.msk.f32.mxu1 %vm296_vm0, %v276_v44  ;;  %3309 = vmatprep.subr.bf16.mxu1 %v3308_v40 }
  0x53   : > { %2737 = vmatmul.mubr.msk.f32.gmra.mrb[10].mxu0 %vm296_vm0, %v273_v36  ;;  %2985 = vmatmul.mubr.msk.f32.gmra.mrb[8].mxu1 %vm296_vm0, %v277_v46 }
  0x54   : > { %445 = vmatprep.mubr.f32.mxu0 %v3766_v0  ;;  %3311 = vmatpush3.bf16.msra.mxu1 %v3308_v40 }
  0x55   : > { %2987 = vmatprep.mubr.msk.f32.mxu1 %vm296_vm0, %v278_v47  ;;  %3313 = vmatprep.subr.bf16.mxu1 %v3312_v45 }
  0x57   : > { %2738 = vmatmul.mubr.msk.f32.gmra.mrb[12].mxu0 %vm296_vm0, %v274_v39  ;;  %2988 = vmatmul.mubr.msk.f32.gmra.mrb[10].mxu1 %vm296_vm0, %v279_v48 }
  0x58   : > { %451 = vmatprep.mubr.f32.mxu0 %v3766_v0  ;;  %3315 = vmatpush3.bf16.msra.mxu1 %v3312_v45 }
  0x59   : > { %2990 = vmatprep.mubr.msk.f32.mxu1 %vm296_vm0, %v280_v49  ;;  %3317 = vmatprep.subr.bf16.mxu1 %v3316_v55 }
  0x5b   : > { %2739 = vmatmul.mubr.msk.f32.gmra.mrb[14].mxu0 %vm296_vm0, %v275_v41  ;;  %2991 = vmatmul.mubr.msk.f32.gmra.mrb[12].mxu1 %vm296_vm0, %v281_v50 }
  0x5c   : > { %457 = vmatprep.mubr.f32.mxu0 %v3766_v0  ;;  %2993 = vmatprep.mubr.msk.f32.mxu1 %vm296_vm0, %v282_v51 }
  0x5d   : > { %3319 = vmatpush3.bf16.msra.mxu1 %v3316_v55 }
  0x5e   : > { %3321 = vmatprep.subr.bf16.mxu1 %v3320_v58 }
  0x5f   : > { %2740 = vmatmul.mubr.msk.f32.gmra.mrb[16].mxu0 %vm296_vm0, %v276_v44  ;;  %2994 = vmatmul.mubr.msk.f32.gmra.mrb[14].mxu1 %vm296_vm0, %v283_v52 }
  0x60   : > { %463 = vmatprep.mubr.f32.mxu0 %v3766_v0 }
  0x61   : > { %3323 = vmatpush3.bf16.msra.mxu1 %v3320_v58 }
  0x63   : > { %2741 = vmatmul.mubr.msk.f32.gmra.mrb[18].mxu0 %vm296_vm0, %v277_v46 }
  0x64   : > { %469 = vmatprep.mubr.f32.mxu0 %v3766_v0 }
  0x67   : > { %2742 = vmatmul.mubr.msk.f32.gmra.mrb[20].mxu0 %vm296_vm0, %v278_v47 }
  0x68   : > { %475 = vmatprep.mubr.f32.mxu0 %v3766_v0 }
  0x6b   : > { %2743 = vmatmul.mubr.msk.f32.gmra.mrb[22].mxu0 %vm296_vm0, %v279_v48 }
  0x6c   : > { %481 = vmatprep.mubr.f32.mxu0 %v3766_v0 }
  0x6f   : > { %2744 = vmatmul.mubr.msk.f32.gmra.mrb[24].mxu0 %vm296_vm0, %v280_v49 }
  0x70   : > { %487 = vmatprep.mubr.f32.mxu0 %v3766_v0 }
  0x73   : > { %2745 = vmatmul.mubr.msk.f32.gmra.mrb[26].mxu0 %vm296_vm0, %v281_v50 }
  0x74   : > { %493 = vmatprep.mubr.f32.mxu0 %v3766_v0 }
  0x77   : > { %2746 = vmatmul.mubr.msk.f32.gmra.mrb[28].mxu0 %vm296_vm0, %v282_v51 }
  0x78   : > { %499 = vmatprep.mubr.f32.mxu0 %v3766_v0 }
  0x7b   : > { %2747 = vmatmul.mubr.msk.f32.gmra.mrb[30].mxu0 %vm296_vm0, %v283_v52 }
 0x112   : > { %v411_v60 = vpop.f32.mrb[0].mxu0 }
 0x113   : > { %v656_v61 = vadd.f32 %v3997_v59, %v411_v60  ;;  %v4000_v62 = vpop.f32.mrb[1].mxu0 }
 0x115   : > { %v672_v63 = vmax.f32 %v656_v61, 0.0  ;;  %v1124_v61 = vld [vmem:[#allocation2 + $0x80] sm:$0xff] }
 0x116   : > { %v417_v0 = vpop.f32.mrb[2].mxu0 }
 0x117   : > { %v657_v1 = vadd.f32 %v3997_v59, %v417_v0  ;;  %v4003_v2 = vpop.f32.mrb[3].mxu0  ;;  %3028 = vmatprep.mubr.f32.mxu1 %v672_v63  ;;  %v1125_v63 = vld [vmem:[#allocation2 + $0x88] sm:$0xff]  ;;  %v1126_v0 = vld [vmem:[#allocation2 + $0x90] sm:$0xff] }
 0x119   : > { %v673_v3 = vmax.f32 %v657_v1, 0.0  ;;  %v3324_v1 = vpack.c.bf16 %v1125_v63, %v1124_v61  ;;  %v1137_v61 = vld [vmem:[#allocation2 + $0xe8] sm:$0xff] }
 0x11a   : > { %v423_v4 = vpop.f32.mrb[4].mxu0 }
 0x11b   : > { %v658_v5 = vadd.f32 %v3997_v59, %v423_v4  ;;  %v4006_v6 = vpop.f32.mrb[5].mxu0  ;;  %3029 = vmatmul.mubr.f32.vlgmr.msra.gmra.mrb[16].mxu1 %v673_v3  ;;  %v1127_v3 = vld [vmem:[#allocation2 + $0x98] sm:$0xff]  ;;  %3325 = vmatprep.subr.bf16.mxu0 %v3324_v1 }
 0x11c   : > { %v3328_v4 = vpack.c.bf16 %v1127_v3, %v1126_v0  ;;  %3327 = vmatpush3.bf16.msra.mxu0 %v3324_v1 }
 0x11d   : > { %v674_v7 = vmax.f32 %v658_v5, 0.0  ;;  %v1128_v5 = vld [vmem:[#allocation2 + $0xa0] sm:$0xff] }
 0x11e   : > { %v429_v8 = vpop.f32.mrb[6].mxu0  ;;  %3329 = vmatprep.subr.bf16.mxu0 %v3328_v4 }
 0x11f   : > { %v659_v9 = vadd.f32 %v3997_v59, %v429_v8  ;;  %v4009_v10 = vpop.f32.mrb[7].mxu0  ;;  %3031 = vmatprep.mubr.f32.mxu1 %v674_v7  ;;  %v1129_v7 = vld [vmem:[#allocation2 + $0xa8] sm:$0xff] }
 0x120   : > { %v3332_v8 = vpack.c.bf16 %v1129_v7, %v1128_v5  ;;  %3331 = vmatpush3.bf16.msra.mxu0 %v3328_v4 }
 0x121   : > { %v675_v11 = vmax.f32 %v659_v9, 0.0  ;;  %v1130_v9 = vld [vmem:[#allocation2 + $0xb0] sm:$0xff] }
 0x122   : > { %v435_v12 = vpop.f32.mrb[8].mxu0  ;;  %3333 = vmatprep.subr.bf16.mxu0 %v3332_v8 }
 0x123   : > { %v660_v13 = vadd.f32 %v3997_v59, %v435_v12  ;;  %v4012_v14 = vpop.f32.mrb[9].mxu0  ;;  %3032 = vmatmul.mubr.f32.gmra.mrb[18].mxu1 %v675_v11  ;;  %v1131_v11 = vld [vmem:[#allocation2 + $0xb8] sm:$0xff]  ;;  %v1132_v12 = vld [vmem:[#allocation2 + $0xc0] sm:$0xff] }
 0x124   : > { %3335 = vmatpush3.bf16.msra.mxu0 %v3332_v8  ;;  %v1138_v8 = vld [vmem:[#allocation2 + $0xf0] sm:$0xff] }
 0x125   : > { %v676_v15 = vmax.f32 %v660_v13, 0.0  ;;  %v1133_v13 = vld [vmem:[#allocation2 + $0xc8] sm:$0xff] }
 0x126   : > { %v441_v16 = vpop.f32.mrb[10].mxu0 }
 0x127   : > { %v661_v17 = vadd.f32 %v3997_v59, %v441_v16  ;;  %v4015_v18 = vpop.f32.mrb[11].mxu0  ;;  %3034 = vmatprep.mubr.f32.mxu1 %v676_v15  ;;  %v3340_v15 = vpack.c.bf16 %v1133_v13, %v1132_v12  ;;  %v4050_v16 = vld [vmem:[%s5066_s3 + $0x1] ss:$0 sm:$0xff] }
 0x129   : > { %v677_v19 = vmax.f32 %v661_v17, 0.0 }
 0x12a   : > { %v447_v20 = vpop.f32.mrb[12].mxu0 }
 0x12b   : > { %v662_v21 = vadd.f32 %v3997_v59, %v447_v20  ;;  %v4018_v22 = vpop.f32.mrb[13].mxu0  ;;  %3035 = vmatmul.mubr.f32.gmra.mrb[20].mxu1 %v677_v19 }
 0x12d   : > { %v678_v23 = vmax.f32 %v662_v21, 0.0 }
 0x12e   : > { %v453_v24 = vpop.f32.mrb[14].mxu0 }
 0x12f   : > { %v663_v25 = vadd.f32 %v3997_v59, %v453_v24  ;;  %v4021_v26 = vpop.f32.mrb[15].mxu0  ;;  %3037 = vmatprep.mubr.f32.mxu1 %v678_v23 }
 0x131   : > { %v679_v27 = vmax.f32 %v663_v25, 0.0 }
 0x132   : > { %v459_v28 = vpop.f32.mrb[16].mxu0 }
 0x133   : > { %v664_v29 = vadd.f32 %v3997_v59, %v459_v28  ;;  %v4024_v30 = vpop.f32.mrb[17].mxu0  ;;  %3038 = vmatmul.mubr.f32.gmra.mrb[22].mxu1 %v679_v27 }
 0x135   : > { %v680_v31 = vmax.f32 %v664_v29, 0.0 }
 0x136   : > { %v465_v32 = vpop.f32.mrb[18].mxu0 }
 0x137   : > { %v665_v33 = vadd.f32 %v3997_v59, %v465_v32  ;;  %v4027_v34 = vpop.f32.mrb[19].mxu0  ;;  %3040 = vmatprep.mubr.f32.mxu1 %v680_v31 }
 0x139   : > { %v681_v35 = vmax.f32 %v665_v33, 0.0 }
 0x13a   : > { %v471_v36 = vpop.f32.mrb[20].mxu0 }
 0x13b   : > { %v666_v37 = vadd.f32 %v3997_v59, %v471_v36  ;;  %v4030_v38 = vpop.f32.mrb[21].mxu0  ;;  %3041 = vmatmul.mubr.f32.gmra.mrb[24].mxu1 %v681_v35 }
 0x13d   : > { %v682_v39 = vmax.f32 %v666_v37, 0.0 }
 0x13e   : > { %v477_v40 = vpop.f32.mrb[22].mxu0 }
 0x13f   : > { %v667_v41 = vadd.f32 %v3997_v59, %v477_v40  ;;  %v4033_v42 = vpop.f32.mrb[23].mxu0  ;;  %3043 = vmatprep.mubr.f32.mxu1 %v682_v39 }
 0x141   : > { %v683_v43 = vmax.f32 %v667_v41, 0.0 }
 0x142   : > { %v483_v44 = vpop.f32.mrb[24].mxu0 }
 0x143   : > { %v668_v45 = vadd.f32 %v3997_v59, %v483_v44  ;;  %v4036_v46 = vpop.f32.mrb[25].mxu0  ;;  %3044 = vmatmul.mubr.f32.gmra.mrb[26].mxu1 %v683_v43 }
 0x145   : > { %v684_v47 = vmax.f32 %v668_v45, 0.0 }
 0x146   : > { %v489_v48 = vpop.f32.mrb[26].mxu0 }
 0x147   : > { %v669_v49 = vadd.f32 %v3997_v59, %v489_v48  ;;  %v4039_v50 = vpop.f32.mrb[27].mxu0  ;;  %3046 = vmatprep.mubr.f32.mxu1 %v684_v47 }
 0x149   : > { %v685_v51 = vmax.f32 %v669_v49, 0.0 }
 0x14a   : > { %v495_v52 = vpop.f32.mrb[28].mxu0 }
 0x14b   : > { %v670_v53 = vadd.f32 %v3997_v59, %v495_v52  ;;  %v4042_v54 = vpop.f32.mrb[29].mxu0  ;;  %3047 = vmatmul.mubr.f32.gmra.mrb[28].mxu1 %v685_v51 }
 0x14d   : > { %v686_v55 = vmax.f32 %v670_v53, 0.0 }
 0x14e   : > { %v501_v56 = vpop.f32.mrb[30].mxu0 }
 0x14f   : > { %v671_v57 = vadd.f32 %v3997_v59, %v501_v56  ;;  %v4045_v58 = vpop.f32.mrb[31].mxu0  ;;  %3049 = vmatprep.mubr.f32.mxu1 %v686_v55  ;;  %v3336_v59 = vpack.c.bf16 %v1131_v11, %v1130_v9  ;;  %v1134_v55 = vld [vmem:[#allocation2 + $0xd0] sm:$0xff]  ;;  %v1135_v56 = vld [vmem:[#allocation2 + $0xd8] sm:$0xff] }
 0x150   : > { %v1139_v9 = vld [vmem:[#allocation2 + $0xf8] sm:$0xff] }
 0x151   : > { %v687_v60 = vmax.f32 %v671_v57, 0.0  ;;  %3337 = vmatprep.subr.bf16.mxu0 %v3336_v59  ;;  %v3344_v57 = vpack.c.bf16 %v1135_v56, %v1134_v55  ;;  %v3352_v11 = vpack.c.bf16 %v1139_v9, %v1138_v8 }
 0x152   : > { %3339 = vmatpush3.bf16.msra.mxu0 %v3336_v59 }
 0x153   : > { %3050 = vmatmul.mubr.f32.gmra.mrb[30].mxu1 %v687_v60  ;;  %3341 = vmatprep.subr.bf16.mxu0 %v3340_v15  ;;  %v1136_v60 = vld [vmem:[#allocation2 + $0xe0] sm:$0xff] }
 0x154   : > { %v3348_v0 = vpack.c.bf16 %v1137_v61, %v1136_v60 }
 0x156   : > { %3343 = vmatpush3.bf16.msra.mxu0 %v3340_v15 }
 0x157   : > { %3345 = vmatprep.subr.bf16.mxu0 %v3344_v57 }
 0x15a   : > { %3347 = vmatpush3.bf16.msra.mxu0 %v3344_v57 }
 0x15b   : > { %3349 = vmatprep.subr.bf16.mxu0 %v3348_v0 }
 0x15e   : > { %3351 = vmatpush3.bf16.msra.mxu0 %v3348_v0 }
 0x15f   : > { %3353 = vmatprep.subr.bf16.mxu0 %v3352_v11 }
 0x162   : > { %3355 = vmatpush3.bf16.msra.mxu0 %v3352_v11 }
 0x1ee   : > { %v3030_v17 = vpop.f32.mrb[16].mxu1 }
 0x1ef   : > { %v4053_v19 = vadd.f32 %v3030_v17, %v4050_v16  ;;  %v777_v20 = vpop.f32.mrb[17].mxu1 }
 0x1f0   : > { %v4056_v21 = vadd.f32 %v4050_v16, %v777_v20 }
 0x1f1   : > { %858 = vadd.xlane.f32.xlu0 %v4053_v19  ;;  %v905_v23 = vmul.f32 %v4053_v19, %v4053_v19 }
 0x1f2   : > { %v904_v24 = vmul.f32 %v4056_v21, %v4056_v21 }
 0x1f3   : > { %922 = vadd.xlane.f32.xlu1 %v905_v23 }
 0x1f5   : > { %856 = vadd.xlane.f32.xlu0 %v4056_v21 }
 0x1f6   : > { %v3033_v25 = vpop.f32.mrb[18].mxu1 }
 0x1f7   : > { %v4065_v27 = vadd.f32 %v3033_v25, %v4050_v16  ;;  %920 = vadd.xlane.f32.xlu1 %v904_v24  ;;  %v787_v28 = vpop.f32.mrb[19].mxu1 }
 0x1f8   : > { %v4068_v29 = vadd.f32 %v4050_v16, %v787_v28 }
 0x1f9   : > { %v907_v32 = vmul.f32 %v4065_v27, %v4065_v27 }
 0x1fa   : > { %860 = vadd.xlane.f32.xlu0 %v4068_v29  ;;  %v906_v31 = vmul.f32 %v4068_v29, %v4068_v29 }
 0x1fb   : > { %862 = vadd.xlane.f32.xlu1 %v4065_v27 }
 0x1fe   : > { %924 = vadd.xlane.f32.xlu0 %v906_v31  ;;  %v3036_v33 = vpop.f32.mrb[20].mxu1 }
 0x1ff   : > { %v4077_v35 = vadd.f32 %v3036_v33, %v4050_v16  ;;  %926 = vadd.xlane.f32.xlu1 %v907_v32  ;;  %v797_v36 = vpop.f32.mrb[21].mxu1 }
 0x200   : > { %v4080_v37 = vadd.f32 %v4050_v16, %v797_v36 }
 0x201   : > { %v909_v40 = vmul.f32 %v4077_v35, %v4077_v35 }
 0x202   : > { %864 = vadd.xlane.f32.xlu0 %v4080_v37  ;;  %v908_v39 = vmul.f32 %v4080_v37, %v4080_v37 }
 0x203   : > { %866 = vadd.xlane.f32.xlu1 %v4077_v35 }
 0x206   : > { %928 = vadd.xlane.f32.xlu0 %v908_v39  ;;  %v3039_v41 = vpop.f32.mrb[22].mxu1 }
 0x207   : > { %v4089_v43 = vadd.f32 %v3039_v41, %v4050_v16  ;;  %930 = vadd.xlane.f32.xlu1 %v909_v40  ;;  %v807_v44 = vpop.f32.mrb[23].mxu1 }
 0x208   : > { %v4092_v45 = vadd.f32 %v4050_v16, %v807_v44 }
 0x209   : > { %v911_v48 = vmul.f32 %v4089_v43, %v4089_v43 }
 0x20a   : > { %868 = vadd.xlane.f32.xlu0 %v4092_v45  ;;  %v910_v47 = vmul.f32 %v4092_v45, %v4092_v45 }
 0x20b   : > { %870 = vadd.xlane.f32.xlu1 %v4089_v43 }
 0x20e   : > { %932 = vadd.xlane.f32.xlu0 %v910_v47  ;;  %v3042_v49 = vpop.f32.mrb[24].mxu1 }
 0x20f   : > { %v4101_v51 = vadd.f32 %v3042_v49, %v4050_v16  ;;  %934 = vadd.xlane.f32.xlu1 %v911_v48  ;;  %v817_v52 = vpop.f32.mrb[25].mxu1 }
 0x210   : > { %v4104_v53 = vadd.f32 %v4050_v16, %v817_v52 }
 0x211   : > { %v913_v1 = vmul.f32 %v4101_v51, %v4101_v51 }
 0x212   : > { %872 = vadd.xlane.f32.xlu0 %v4104_v53  ;;  %v912_v63 = vmul.f32 %v4104_v53, %v4104_v53 }
 0x213   : > { %874 = vadd.xlane.f32.xlu1 %v4101_v51 }
 0x216   : > { %936 = vadd.xlane.f32.xlu0 %v912_v63  ;;  %v3045_v3 = vpop.f32.mrb[26].mxu1 }
 0x217   : > { %v4113_v4 = vadd.f32 %v3045_v3, %v4050_v16  ;;  %938 = vadd.xlane.f32.xlu1 %v913_v1  ;;  %v827_v5 = vpop.f32.mrb[27].mxu1 }
 0x218   : > { %v4116_v7 = vadd.f32 %v4050_v16, %v827_v5 }
 0x219   : > { %v915_v12 = vmul.f32 %v4113_v4, %v4113_v4 }
 0x21a   : > { %876 = vadd.xlane.f32.xlu0 %v4116_v7  ;;  %v914_v59 = vmul.f32 %v4116_v7, %v4116_v7 }
 0x21b   : > { %878 = vadd.xlane.f32.xlu1 %v4113_v4 }
 0x21e   : > { %940 = vadd.xlane.f32.xlu0 %v914_v59  ;;  %v3048_v13 = vpop.f32.mrb[28].mxu1 }
 0x21f   : > { %v4125_v15 = vadd.f32 %v3048_v13, %v4050_v16  ;;  %942 = vadd.xlane.f32.xlu1 %v915_v12  ;;  %v837_v17 = vpop.f32.mrb[29].mxu1 }
 0x220   : > { %v4128_v20 = vadd.f32 %v4050_v16, %v837_v17  ;;  %v4159_v17 = vld [vmem:[%s5066_s3 + $0x2] ss:$0 sm:$0xff] }
 0x221   : > { %v917_v24 = vmul.f32 %v4125_v15, %v4125_v15 }
 0x222   : > { %880 = vadd.xlane.f32.xlu0 %v4128_v20  ;;  %v916_v23 = vmul.f32 %v4128_v20, %v4128_v20 }
 0x223   : > { %882 = vadd.xlane.f32.xlu1 %v4125_v15 }
 0x226   : > { %944 = vadd.xlane.f32.xlu0 %v916_v23  ;;  %v3051_v25 = vpop.f32.mrb[30].mxu1 }
 0x227   : > { %v4137_v28 = vadd.f32 %v3051_v25, %v4050_v16  ;;  %946 = vadd.xlane.f32.xlu1 %v917_v24  ;;  %v847_v31 = vpop.f32.mrb[31].mxu1 }
 0x228   : > { %v4140_v32 = vadd.f32 %v4050_v16, %v847_v31 }
 0x229   : > { %v919_v36 = vmul.f32 %v4137_v28, %v4137_v28 }
 0x22a   : > { %884 = vadd.xlane.f32.xlu0 %v4140_v32  ;;  %v918_v33 = vmul.f32 %v4140_v32, %v4140_v32 }
 0x22b   : > { %886 = vadd.xlane.f32.xlu1 %v4137_v28 }
 0x22e   : > { %948 = vadd.xlane.f32.xlu0 %v918_v33 }
 0x22f   : > { %950 = vadd.xlane.f32.xlu1 %v919_v36 }
 0x27e   : > { %v859_v39 = vpop.xlane.xlu0 %858 }
 0x27f   : > { %v889_v40 = vmul.f32 0.0078125, %v859_v39 }
 0x280   : > { %v923_v41 = vpop.xlane.xlu1 %922 }
 0x281   : > { %v969_v44 = vmul.f32 %v889_v40, %v889_v40  ;;  %v953_v47 = vmul.f32 0.0078125, %v923_v41 }
 0x282   : > { %v857_v48 = vpop.xlane.xlu0 %856 }
 0x283   : > { %v985_v16 = vsub.f32 %v953_v47, %v969_v44  ;;  %v888_v49 = vmul.f32 0.0078125, %v857_v48  ;;  %v1001_v47 = vsub.f32 %v4053_v19, %v889_v40  ;;  %v4175_v19 = vld [vmem:[%s5066_s3 + $0x3] ss:$0 sm:$0xff] }
 0x284   : > { %v921_v52 = vpop.xlane.xlu1 %920 }
 0x285   : > { %v1017_v55 = vadd.f32 1e-05, %v985_v16  ;;  %v968_v56 = vmul.f32 %v888_v49, %v888_v49  ;;  %v952_v57 = vmul.f32 0.0078125, %v921_v52 }
 0x287   : > { %3539 = vrsqrt.f32 %v1017_v55  ;;  %v984_v60 = vsub.f32 %v952_v57, %v968_v56  ;;  %v861_v61 = vpop.xlane.xlu0 %860 }
 0x288   : > { %v4148_v63 = vmul.f32 0.0078125, %v861_v61  ;;  %v863_v0 = vpop.xlane.xlu1 %862 }
 0x289   : > { %v1016_v1 = vadd.f32 1e-05, %v984_v60  ;;  %v4150_v3 = vmul.f32 0.0078125, %v863_v0  ;;  %v1000_v0 = vsub.f32 %v4056_v21, %v888_v49 }
 0x28a   : > { %v970_v8 = vmul.f32 %v4148_v63, %v4148_v63 }
 0x28b   : > { %3541 = vrsqrt.f32 %v1016_v1  ;;  %v925_v5 = vpop.xlane.xlu0 %924  ;;  %v971_v59 = vmul.f32 %v4150_v3, %v4150_v3 }
 0x28c   : > { %v954_v9 = vmul.f32 0.0078125, %v925_v5  ;;  %v927_v11 = vpop.xlane.xlu1 %926 }
 0x28d   : > { %v955_v12 = vmul.f32 0.0078125, %v927_v11 }
 0x28e   : > { %v986_v13 = vsub.f32 %v954_v9, %v970_v8 }
 0x28f   : > { %v987_v23 = vsub.f32 %v955_v12, %v971_v59  ;;  %v865_v24 = vpop.xlane.xlu0 %864 }
 0x290   : > { %v1018_v25 = vadd.f32 1e-05, %v986_v13  ;;  %v4161_v31 = vmul.f32 0.0078125, %v865_v24  ;;  %v867_v33 = vpop.xlane.xlu1 %866 }
 0x291   : > { %v3540_v36 = vpop.eup %3539  ;;  %v1019_v39 = vadd.f32 1e-05, %v987_v23  ;;  %v4163_v41 = vmul.f32 0.0078125, %v867_v33  ;;  %v1002_v33 = vsub.f32 %v4068_v29, %v4148_v63 }
 0x292   : > { %v1053_v44 = vmul.f32 %v3540_v36, %v4159_v17  ;;  %3543 = vrsqrt.f32 %v1018_v25  ;;  %v972_v16 = vmul.f32 %v4161_v31, %v4161_v31 }
 0x293   : > { %3545 = vrsqrt.f32 %v1019_v39  ;;  %v929_v48 = vpop.xlane.xlu0 %928  ;;  %v973_v57 = vmul.f32 %v4163_v41, %v4163_v41 }
 0x294   : > { %v956_v52 = vmul.f32 0.0078125, %v929_v48  ;;  %v931_v55 = vpop.xlane.xlu1 %930  ;;  %v1069_v61 = vmul.f32 %v1053_v44, %v1001_v47 }
 0x295   : > { %v3542_v56 = vpop.eup %3541  ;;  %v957_v60 = vmul.f32 0.0078125, %v931_v55 }
 0x296   : > { %v988_v1 = vsub.f32 %v956_v52, %v972_v16  ;;  %v1052_v40 = vmul.f32 %v3542_v56, %v4159_v17  ;;  %v1089_v21 = vadd.f32 %v4175_v19, %v1069_v61 }
 0x297   : > { %v989_v5 = vsub.f32 %v957_v60, %v973_v57  ;;  %v869_v8 = vpop.xlane.xlu0 %868  ;;  %v1003_v57 = vsub.f32 %v4065_v27, %v4150_v3 }
 0x298   : > { %v1020_v9 = vadd.f32 1e-05, %v988_v1  ;;  %v4178_v11 = vmul.f32 0.0078125, %v869_v8  ;;  %v871_v59 = vpop.xlane.xlu1 %870  ;;  %v1068_v12 = vmul.f32 %v1052_v40, %v1000_v0  ;;  %v1105_v55 = vmax.f32 %v1089_v21, 0.0 }
 0x299   : > { %v1021_v13 = vadd.f32 1e-05, %v989_v5  ;;  %v4180_v23 = vmul.f32 0.0078125, %v871_v59 }
 0x29a   : > { %3547 = vrsqrt.f32 %v1020_v9  ;;  %v1088_v49 = vadd.f32 %v4175_v19, %v1068_v12  ;;  %v974_v36 = vmul.f32 %v4178_v11, %v4178_v11 }
 0x29b   : > { %3549 = vrsqrt.f32 %v1021_v13  ;;  %v933_v24 = vpop.xlane.xlu0 %932  ;;  %v975_v16 = vmul.f32 %v4180_v23, %v4180_v23 }
 0x29c   : > { %v3544_v25 = vpop.eup %3543  ;;  %v958_v39 = vmul.f32 0.0078125, %v933_v24  ;;  %v935_v44 = vpop.xlane.xlu1 %934  ;;  %v1104_v47 = vmax.f32 %v1088_v49, 0.0 }
 0x29d   : > { %v3546_v48 = vpop.eup %3545  ;;  %v959_v52 = vmul.f32 0.0078125, %v935_v44  ;;  %v1054_v56 = vmul.f32 %v3544_v25, %v4159_v17 }
 0x29e   : > { %v990_v60 = vsub.f32 %v958_v39, %v974_v36  ;;  %3084 = vmatprep.mubr.f32.mxu0 %v1104_v47  ;;  %v1055_v29 = vmul.f32 %v3546_v48, %v4159_v17  ;;  %v1004_v39 = vsub.f32 %v4080_v37, %v4161_v31 }
 0x29f   : > { %v991_v63 = vsub.f32 %v959_v52, %v975_v16  ;;  %3085 = vmatmul.mubr.f32.vlgmr.msra.gmra.mrb[32].mxu0 %v1105_v55  ;;  %v873_v61 = vpop.xlane.xlu0 %872  ;;  %v1070_v0 = vmul.f32 %v1054_v56, %v1002_v33  ;;  %v1005_v16 = vsub.f32 %v4077_v35, %v4163_v41 }
 0x2a0   : > { %v1022_v1 = vadd.f32 1e-05, %v990_v60  ;;  %v4194_v40 = vmul.f32 0.0078125, %v873_v61  ;;  %v875_v5 = vpop.xlane.xlu1 %874  ;;  %v1071_v8 = vmul.f32 %v1055_v29, %v1003_v57 }
 0x2a1   : > { %v1023_v9 = vadd.f32 1e-05, %v991_v63  ;;  %v4196_v59 = vmul.f32 0.0078125, %v875_v5  ;;  %v1090_v12 = vadd.f32 %v4175_v19, %v1070_v0 }
 0x2a2   : > { %3551 = vrsqrt.f32 %v1022_v1  ;;  %v1091_v27 = vadd.f32 %v4175_v19, %v1071_v8  ;;  %v976_v49 = vmul.f32 %v4194_v40, %v4194_v40 }
 0x2a3   : > { %3553 = vrsqrt.f32 %v1023_v9  ;;  %v937_v3 = vpop.xlane.xlu0 %936  ;;  %v1106_v13 = vmax.f32 %v1090_v12, 0.0  ;;  %v977_v44 = vmul.f32 %v4196_v59, %v4196_v59 }
 0x2a4   : > { %v3548_v21 = vpop.eup %3547  ;;  %v960_v24 = vmul.f32 0.0078125, %v937_v3  ;;  %v939_v25 = vpop.xlane.xlu1 %938  ;;  %v1107_v33 = vmax.f32 %v1091_v27, 0.0 }
 0x2a5   : > { %v3550_v36 = vpop.eup %3549  ;;  %v961_v47 = vmul.f32 0.0078125, %v939_v25  ;;  %3087 = vmatprep.mubr.f32.mxu0 %v1106_v13  ;;  %v1056_v48 = vmul.f32 %v3548_v21, %v4159_v17  ;;  %v1006_v21 = vsub.f32 %v4092_v45, %v4178_v11 }
 0x2a6   : > { %v992_v52 = vsub.f32 %v960_v24, %v976_v49  ;;  %3088 = vmatmul.mubr.f32.gmra.mrb[34].mxu0 %v1107_v33  ;;  %v1057_v55 = vmul.f32 %v3550_v36, %v4159_v17  ;;  %v1007_v33 = vsub.f32 %v4089_v43, %v4180_v23 }
 0x2a7   : > { %v993_v56 = vsub.f32 %v961_v47, %v977_v44  ;;  %v877_v57 = vpop.xlane.xlu0 %876  ;;  %v1072_v60 = vmul.f32 %v1056_v48, %v1004_v39 }
 0x2a8   : > { %v1024_v29 = vadd.f32 1e-05, %v992_v52  ;;  %v4210_v63 = vmul.f32 0.0078125, %v877_v57  ;;  %v879_v37 = vpop.xlane.xlu1 %878  ;;  %v1073_v31 = vmul.f32 %v1057_v55, %v1005_v16 }
 0x2a9   : > { %v1025_v61 = vadd.f32 1e-05, %v993_v56  ;;  %v4212_v0 = vmul.f32 0.0078125, %v879_v37  ;;  %v1092_v1 = vadd.f32 %v4175_v19, %v1072_v60 }
 0x2aa   : > { %3555 = vrsqrt.f32 %v1024_v29  ;;  %v1093_v35 = vadd.f32 %v4175_v19, %v1073_v31  ;;  %v978_v9 = vmul.f32 %v4210_v63, %v4210_v63 }
 0x2ab   : > { %3557 = vrsqrt.f32 %v1025_v61  ;;  %v941_v41 = vpop.xlane.xlu0 %940  ;;  %v1108_v5 = vmax.f32 %v1092_v1, 0.0  ;;  %v979_v49 = vmul.f32 %v4212_v0, %v4212_v0 }
 0x2ac   : > { %v3552_v8 = vpop.eup %3551  ;;  %v962_v12 = vmul.f32 0.0078125, %v941_v41  ;;  %v943_v27 = vpop.xlane.xlu1 %942  ;;  %v1109_v3 = vmax.f32 %v1093_v35, 0.0  ;;  %v1008_v41 = vsub.f32 %v4104_v53, %v4194_v40 }
 0x2ad   : > { %v3554_v13 = vpop.eup %3553  ;;  %v963_v24 = vmul.f32 0.0078125, %v943_v27  ;;  %3090 = vmatprep.mubr.f32.mxu0 %v1108_v5  ;;  %v1058_v25 = vmul.f32 %v3552_v8, %v4159_v17 }
 0x2ae   : > { %v994_v36 = vsub.f32 %v962_v12, %v978_v9  ;;  %3091 = vmatmul.mubr.f32.gmra.mrb[36].mxu0 %v1109_v3  ;;  %v1059_v39 = vmul.f32 %v3554_v13, %v4159_v17  ;;  %v1009_v12 = vsub.f32 %v4101_v51, %v4196_v59 }
 0x2af   : > { %v995_v44 = vsub.f32 %v963_v24, %v979_v49  ;;  %v881_v47 = vpop.xlane.xlu0 %880  ;;  %v1074_v48 = vmul.f32 %v1058_v25, %v1006_v21 }
 0x2b0   : > { %v1026_v16 = vadd.f32 1e-05, %v994_v36  ;;  %v4226_v52 = vmul.f32 0.0078125, %v881_v47  ;;  %v883_v45 = vpop.xlane.xlu1 %882  ;;  %v1075_v11 = vmul.f32 %v1059_v39, %v1007_v33 }
 0x2b1   : > { %v1027_v55 = vadd.f32 1e-05, %v995_v44  ;;  %v4228_v56 = vmul.f32 0.0078125, %v883_v45  ;;  %v1094_v57 = vadd.f32 %v4175_v19, %v1074_v48 }
 0x2b2   : > { %3559 = vrsqrt.f32 %v1026_v16  ;;  %v1095_v43 = vadd.f32 %v4175_v19, %v1075_v11  ;;  %v980_v37 = vmul.f32 %v4226_v52, %v4226_v52 }
 0x2b3   : > { %3561 = vrsqrt.f32 %v1027_v55  ;;  %v945_v23 = vpop.xlane.xlu0 %944  ;;  %v1110_v60 = vmax.f32 %v1094_v57, 0.0  ;;  %v981_v5 = vmul.f32 %v4228_v56, %v4228_v56  ;;  %v1010_v57 = vsub.f32 %v4116_v7, %v4210_v63 }
 0x2b4   : > { %v3556_v29 = vpop.eup %3555  ;;  %v964_v31 = vmul.f32 0.0078125, %v945_v23  ;;  %v947_v61 = vpop.xlane.xlu1 %946  ;;  %v1111_v1 = vmax.f32 %v1095_v43, 0.0 }
 0x2b5   : > { %v3558_v35 = vpop.eup %3557  ;;  %v965_v8 = vmul.f32 0.0078125, %v947_v61  ;;  %3093 = vmatprep.mubr.f32.mxu0 %v1110_v60  ;;  %v1060_v9 = vmul.f32 %v3556_v29, %v4159_v17  ;;  %v1011_v29 = vsub.f32 %v4113_v4, %v4212_v0  ;;  %v1012_v4 = vsub.f32 %v4128_v20, %v4226_v52 }
 0x2b6   : > { %v996_v27 = vsub.f32 %v964_v31, %v980_v37  ;;  %3094 = vmatmul.mubr.f32.gmra.mrb[38].mxu0 %v1111_v1  ;;  %v1061_v3 = vmul.f32 %v3558_v35, %v4159_v17 }
 0x2b7   : > { %v997_v13 = vsub.f32 %v965_v8, %v981_v5  ;;  %v885_v21 = vpop.xlane.xlu0 %884  ;;  %v1076_v49 = vmul.f32 %v1060_v9, %v1008_v41 }
 0x2b8   : > { %v1028_v24 = vadd.f32 1e-05, %v996_v27  ;;  %v902_v25 = vmul.f32 0.0078125, %v885_v21  ;;  %v887_v53 = vpop.xlane.xlu1 %886  ;;  %v1077_v40 = vmul.f32 %v1061_v3, %v1009_v12  ;;  %v1013_v3 = vsub.f32 %v4125_v15, %v4228_v56 }
 0x2b9   : > { %v1029_v33 = vadd.f32 1e-05, %v997_v13  ;;  %v903_v36 = vmul.f32 0.0078125, %v887_v53  ;;  %v1096_v39 = vadd.f32 %v4175_v19, %v1076_v49 }
 0x2ba   : > { %3563 = vrsqrt.f32 %v1028_v24  ;;  %v1097_v44 = vadd.f32 %v4175_v19, %v1077_v40  ;;  %v982_v48 = vmul.f32 %v902_v25, %v902_v25  ;;  %v1014_v20 = vsub.f32 %v4140_v32, %v902_v25  ;;  %v1574_v32 = vld [vmem:[#allocation2 + $0x108] sm:$0xff] }
 0x2bb   : > { %3565 = vrsqrt.f32 %v1029_v33  ;;  %v949_v51 = vpop.xlane.xlu0 %948  ;;  %v1112_v59 = vmax.f32 %v1096_v39, 0.0  ;;  %v983_v43 = vmul.f32 %v903_v36, %v903_v36  ;;  %v1015_v15 = vsub.f32 %v4137_v28, %v903_v36  ;;  %v4269_v28 = vld [vmem:[%s5066_s3 + $0x4] ss:$0 sm:$0xff] }
 0x2bc   : > { %v3560_v47 = vpop.eup %3559  ;;  %v966_v16 = vmul.f32 0.0078125, %v949_v51  ;;  %v951_v45 = vpop.xlane.xlu1 %950  ;;  %v1113_v11 = vmax.f32 %v1097_v44, 0.0 }
 0x2bd   : > { %v3562_v55 = vpop.eup %3561  ;;  %v967_v23 = vmul.f32 0.0078125, %v951_v45  ;;  %3096 = vmatprep.mubr.f32.mxu0 %v1112_v59  ;;  %v1062_v60 = vmul.f32 %v3560_v47, %v4159_v17 }
 0x2be   : > { %v998_v37 = vsub.f32 %v966_v16, %v982_v48  ;;  %3097 = vmatmul.mubr.f32.gmra.mrb[40].mxu0 %v1113_v11  ;;  %v1063_v31 = vmul.f32 %v3562_v55, %v4159_v17  ;;  %v1573_v11 = vld [vmem:[#allocation2 + $0x100] sm:$0xff] }
 0x2bf   : > { %v999_v61 = vsub.f32 %v967_v23, %v983_v43  ;;  %v1078_v1 = vmul.f32 %v1062_v60, %v1010_v57  ;;  %v3356_v25 = vpack.c.bf16 %v1574_v32, %v1573_v11 }
 0x2c0   : > { %v1030_v35 = vadd.f32 1e-05, %v998_v37  ;;  %v1079_v41 = vmul.f32 %v1063_v31, %v1011_v29 }
 0x2c1   : > { %v1031_v5 = vadd.f32 1e-05, %v999_v61  ;;  %v1098_v8 = vadd.f32 %v4175_v19, %v1078_v1  ;;  %3357 = vmatprep.subr.bf16.mxu1 %v3356_v25 }
 0x2c2   : > { %3567 = vrsqrt.f32 %v1030_v35  ;;  %v1099_v7 = vadd.f32 %v4175_v19, %v1079_v41  ;;  %3359 = vmatpush3.bf16.msra.mxu1 %v3356_v25 }
 0x2c3   : > { %3569 = vrsqrt.f32 %v1031_v5  ;;  %v1114_v63 = vmax.f32 %v1098_v8, 0.0 }
 0x2c4   : > { %v3564_v9 = vpop.eup %3563  ;;  %v1115_v12 = vmax.f32 %v1099_v7, 0.0 }
 0x2c5   : > { %v3566_v27 = vpop.eup %3565  ;;  %3099 = vmatprep.mubr.f32.mxu0 %v1114_v63  ;;  %v1064_v0 = vmul.f32 %v3564_v9, %v4159_v17  ;;  %v1575_v63 = vld [vmem:[#allocation2 + $0x110] sm:$0xff]  ;;  %v1576_v9 = vld [vmem:[#allocation2 + $0x118] sm:$0xff] }
 0x2c6   : > { %3100 = vmatmul.mubr.f32.gmra.mrb[42].mxu0 %v1115_v12  ;;  %v1065_v13 = vmul.f32 %v3566_v27, %v4159_v17  ;;  %v3360_v12 = vpack.c.bf16 %v1576_v9, %v1575_v63 }
 0x2c7   : > { %v1080_v21 = vmul.f32 %v1064_v0, %v1012_v4  ;;  %v1577_v0 = vld [vmem:[#allocation2 + $0x120] sm:$0xff] }
 0x2c8   : > { %v1081_v49 = vmul.f32 %v1065_v13, %v1013_v3  ;;  %3361 = vmatprep.subr.bf16.mxu1 %v3360_v12 }
 0x2c9   : > { %v1100_v24 = vadd.f32 %v4175_v19, %v1080_v21  ;;  %3363 = vmatpush3.bf16.msra.mxu1 %v3360_v12 }
 0x2ca   : > { %v1101_v53 = vadd.f32 %v4175_v19, %v1081_v49 }
 0x2cb   : > { %v1116_v40 = vmax.f32 %v1100_v24, 0.0 }
 0x2cc   : > { %v3568_v33 = vpop.eup %3567  ;;  %v1117_v39 = vmax.f32 %v1101_v53, 0.0 }
 0x2cd   : > { %v3570_v44 = vpop.eup %3569  ;;  %3102 = vmatprep.mubr.f32.mxu0 %v1116_v40  ;;  %v1066_v52 = vmul.f32 %v3568_v33, %v4159_v17  ;;  %v1579_v40 = vld [vmem:[#allocation2 + $0x130] sm:$0xff]  ;;  %v1580_v33 = vld [vmem:[#allocation2 + $0x138] sm:$0xff] }
 0x2ce   : > { %3103 = vmatmul.mubr.f32.gmra.mrb[44].mxu0 %v1117_v39  ;;  %v1067_v56 = vmul.f32 %v3570_v44, %v4159_v17  ;;  %v3368_v39 = vpack.c.bf16 %v1580_v33, %v1579_v40 }
 0x2cf   : > { %v1082_v51 = vmul.f32 %v1066_v52, %v1014_v20  ;;  %v1582_v52 = vld [vmem:[#allocation2 + $0x148] sm:$0xff] }
 0x2d0   : > { %v1083_v59 = vmul.f32 %v1067_v56, %v1015_v15 }
 0x2d1   : > { %v1102_v47 = vadd.f32 %v4175_v19, %v1082_v51 }
 0x2d2   : > { %v1103_v48 = vadd.f32 %v4175_v19, %v1083_v59 }
 0x2d3   : > { %v1118_v16 = vmax.f32 %v1102_v47, 0.0 }
 0x2d4   : > { %v1119_v45 = vmax.f32 %v1103_v48, 0.0 }
 0x2d5   : > { %3105 = vmatprep.mubr.f32.mxu0 %v1118_v16  ;;  %v1583_v16 = vld [vmem:[#allocation2 + $0x150] sm:$0xff] }
 0x2d6   : > { %3106 = vmatmul.mubr.f32.gmra.mrb[46].mxu0 %v1119_v45  ;;  %v1584_v45 = vld [vmem:[#allocation2 + $0x158] sm:$0xff] }
 0x2d7   : > { %v3376_v11 = vpack.c.bf16 %v1584_v45, %v1583_v16 }
 0x372   : > { %v3086_v17 = vpop.f32.mrb[32].mxu0 }
 0x373   : > { %v1216_v36 = vadd.f32 %v3086_v17, %v4269_v28  ;;  %v1210_v55 = vpop.f32.mrb[33].mxu0  ;;  %v1586_v17 = vld [vmem:[#allocation2 + $0x168] sm:$0xff] }
 0x374   : > { %v1211_v19 = vadd.f32 %v4269_v28, %v1210_v55 }
 0x375   : > { %v4274_v57 = vadd.f32 %v1216_v36, %v4003_v2 }
 0x376   : > { %v4277_v43 = vadd.f32 %v1211_v19, %v4000_v62 }
 0x377   : > { %1307 = vadd.xlane.f32.xlu1 %v4274_v57  ;;  %v1354_v60 = vmul.f32 %v4274_v57, %v4274_v57 }
 0x378   : > { %1305 = vadd.xlane.f32.xlu0 %v4277_v43  ;;  %v1353_v31 = vmul.f32 %v4277_v43, %v4277_v43 }
 0x379   : > { %v3089_v23 = vpop.f32.mrb[34].mxu0 }
 0x37a   : > { %v1226_v29 = vadd.f32 %v3089_v23, %v4269_v28  ;;  %v1220_v37 = vpop.f32.mrb[35].mxu0 }
 0x37b   : > { %v1221_v2 = vadd.f32 %v4269_v28, %v1220_v37  ;;  %1371 = vadd.xlane.f32.xlu1 %v1354_v60  ;;  %v1587_v37 = vld [vmem:[#allocation2 + $0x170] sm:$0xff] }
 0x37c   : > { %v4288_v62 = vadd.f32 %v1226_v29, %v4009_v10  ;;  %1369 = vadd.xlane.f32.xlu0 %v1353_v31  ;;  %v1588_v31 = vld [vmem:[#allocation2 + $0x178] sm:$0xff] }
 0x37d   : > { %v4291_v61 = vadd.f32 %v1221_v2, %v4006_v6  ;;  %v3384_v2 = vpack.c.bf16 %v1588_v31, %v1587_v37  ;;  %v4398_v31 = vld [vmem:[%s5066_s3 + $0x5] ss:$0 sm:$0xff] }
 0x37e   : > { %v1356_v35 = vmul.f32 %v4288_v62, %v4288_v62 }
 0x37f   : > { %1311 = vadd.xlane.f32.xlu1 %v4288_v62  ;;  %v1355_v8 = vmul.f32 %v4291_v61, %v4291_v61 }
 0x380   : > { %1309 = vadd.xlane.f32.xlu0 %v4291_v61 }
 0x381   : > { %v3092_v1 = vpop.f32.mrb[36].mxu0 }
 0x382   : > { %v1236_v41 = vadd.f32 %v3092_v1, %v4269_v28  ;;  %v1230_v5 = vpop.f32.mrb[37].mxu0 }
 0x383   : > { %v1231_v10 = vadd.f32 %v4269_v28, %v1230_v5  ;;  %1375 = vadd.xlane.f32.xlu1 %v1356_v35 }
 0x384   : > { %v4302_v6 = vadd.f32 %v1236_v41, %v4015_v18  ;;  %1373 = vadd.xlane.f32.xlu0 %v1355_v8  ;;  %v1578_v18 = vld [vmem:[#allocation2 + $0x128] sm:$0xff] }
 0x385   : > { %v4305_v7 = vadd.f32 %v1231_v10, %v4012_v14  ;;  %v3364_v21 = vpack.c.bf16 %v1578_v18, %v1577_v0 }
 0x386   : > { %v1358_v4 = vmul.f32 %v4302_v6, %v4302_v6 }
 0x387   : > { %1315 = vadd.xlane.f32.xlu1 %v4302_v6  ;;  %v1357_v14 = vmul.f32 %v4305_v7, %v4305_v7  ;;  %3365 = vmatprep.subr.bf16.mxu1 %v3364_v21 }
 0x388   : > { %1313 = vadd.xlane.f32.xlu0 %v4305_v7  ;;  %3367 = vmatpush3.bf16.msra.mxu1 %v3364_v21 }
 0x389   : > { %v3095_v27 = vpop.f32.mrb[38].mxu0  ;;  %3369 = vmatprep.subr.bf16.mxu1 %v3368_v39 }
 0x38a   : > { %v1246_v3 = vadd.f32 %v3095_v27, %v4269_v28  ;;  %v1240_v13 = vpop.f32.mrb[39].mxu0 }
 0x38b   : > { %v1241_v49 = vadd.f32 %v4269_v28, %v1240_v13  ;;  %1379 = vadd.xlane.f32.xlu1 %v1358_v4 }
 0x38c   : > { %v4316_v24 = vadd.f32 %v1246_v3, %v4021_v26  ;;  %1377 = vadd.xlane.f32.xlu0 %v1357_v14  ;;  %3371 = vmatpush3.bf16.msra.mxu1 %v3368_v39  ;;  %v1581_v26 = vld [vmem:[#allocation2 + $0x140] sm:$0xff] }
 0x38d   : > { %v4319_v53 = vadd.f32 %v1241_v49, %v4018_v22  ;;  %v3372_v51 = vpack.c.bf16 %v1582_v52, %v1581_v26 }
 0x38e   : > { %v1360_v20 = vmul.f32 %v4316_v24, %v4316_v24 }
 0x38f   : > { %1319 = vadd.xlane.f32.xlu1 %v4316_v24  ;;  %v1359_v56 = vmul.f32 %v4319_v53, %v4319_v53  ;;  %3373 = vmatprep.subr.bf16.mxu1 %v3372_v51 }
 0x390   : > { %1317 = vadd.xlane.f32.xlu0 %v4319_v53  ;;  %3375 = vmatpush3.bf16.msra.mxu1 %v3372_v51 }
 0x391   : > { %v3098_v44 = vpop.f32.mrb[40].mxu0  ;;  %3377 = vmatprep.subr.bf16.mxu1 %v3376_v11 }
 0x392   : > { %v1256_v15 = vadd.f32 %v3098_v44, %v4269_v28  ;;  %v1250_v22 = vpop.f32.mrb[41].mxu0 }
 0x393   : > { %v1251_v59 = vadd.f32 %v4269_v28, %v1250_v22  ;;  %1383 = vadd.xlane.f32.xlu1 %v1360_v20 }
 0x394   : > { %v4330_v47 = vadd.f32 %v1256_v15, %v4027_v34  ;;  %1381 = vadd.xlane.f32.xlu0 %v1359_v56  ;;  %3379 = vmatpush3.bf16.msra.mxu1 %v3376_v11  ;;  %v1585_v34 = vld [vmem:[#allocation2 + $0x160] sm:$0xff] }
 0x395   : > { %v4333_v48 = vadd.f32 %v1251_v59, %v4024_v30  ;;  %v3380_v19 = vpack.c.bf16 %v1586_v17, %v1585_v34 }
 0x396   : > { %v1362_v25 = vmul.f32 %v4330_v47, %v4330_v47 }
 0x397   : > { %1323 = vadd.xlane.f32.xlu1 %v4330_v47  ;;  %v1361_v55 = vmul.f32 %v4333_v48, %v4333_v48  ;;  %3381 = vmatprep.subr.bf16.mxu1 %v3380_v19 }
 0x398   : > { %1321 = vadd.xlane.f32.xlu0 %v4333_v48  ;;  %3383 = vmatpush3.bf16.msra.mxu1 %v3380_v19 }
 0x399   : > { %v3101_v32 = vpop.f32.mrb[42].mxu0  ;;  %3385 = vmatprep.subr.bf16.mxu1 %v3384_v2 }
 0x39a   : > { %v1266_v36 = vadd.f32 %v3101_v32, %v4269_v28  ;;  %v1260_v30 = vpop.f32.mrb[43].mxu0 }
 0x39b   : > { %v1261_v23 = vadd.f32 %v4269_v28, %v1260_v30  ;;  %1387 = vadd.xlane.f32.xlu1 %v1362_v25 }
 0x39c   : > { %v4344_v60 = vadd.f32 %v1266_v36, %v4033_v42  ;;  %1385 = vadd.xlane.f32.xlu0 %v1361_v55  ;;  %3387 = vmatpush3.bf16.msra.mxu1 %v3384_v2 }
 0x39d   : > { %v4347_v29 = vadd.f32 %v1261_v23, %v4030_v38 }
 0x39e   : > { %v1364_v35 = vmul.f32 %v4344_v60, %v4344_v60 }
 0x39f   : > { %1327 = vadd.xlane.f32.xlu1 %v4344_v60  ;;  %v1363_v38 = vmul.f32 %v4347_v29, %v4347_v29 }
 0x3a0   : > { %1325 = vadd.xlane.f32.xlu0 %v4347_v29 }
 0x3a1   : > { %v3104_v1 = vpop.f32.mrb[44].mxu0 }
 0x3a2   : > { %v1276_v42 = vadd.f32 %v3104_v1, %v4269_v28  ;;  %v1270_v41 = vpop.f32.mrb[45].mxu0 }
 0x3a3   : > { %v1271_v5 = vadd.f32 %v4269_v28, %v1270_v41  ;;  %1391 = vadd.xlane.f32.xlu1 %v1364_v35 }
 0x3a4   : > { %v4358_v8 = vadd.f32 %v1276_v42, %v4039_v50  ;;  %1389 = vadd.xlane.f32.xlu0 %v1363_v38 }
 0x3a5   : > { %v4361_v10 = vadd.f32 %v1271_v5, %v4036_v46 }
 0x3a6   : > { %v1366_v9 = vmul.f32 %v4358_v8, %v4358_v8 }
 0x3a7   : > { %1331 = vadd.xlane.f32.xlu1 %v4358_v8  ;;  %v1365_v4 = vmul.f32 %v4361_v10, %v4361_v10 }
 0x3a8   : > { %1329 = vadd.xlane.f32.xlu0 %v4361_v10 }
 0x3a9   : > { %v3107_v63 = vpop.f32.mrb[46].mxu0 }
 0x3aa   : > { %v1286_v12 = vadd.f32 %v3107_v63, %v4269_v28  ;;  %v1280_v27 = vpop.f32.mrb[47].mxu0 }
 0x3ab   : > { %v1281_v50 = vadd.f32 %v4269_v28, %v1280_v27  ;;  %1395 = vadd.xlane.f32.xlu1 %v1366_v9 }
 0x3ac   : > { %v4372_v46 = vadd.f32 %v1286_v12, %v4045_v58  ;;  %1393 = vadd.xlane.f32.xlu0 %v1365_v4 }
 0x3ad   : > { %v4375_v0 = vadd.f32 %v1281_v50, %v4042_v54  ;;  %v4410_v50 = vld [vmem:[%s5066_s3 + $0x6] ss:$0 sm:$0xff] }
 0x3ae   : > { %v1368_v18 = vmul.f32 %v4372_v46, %v4372_v46 }
 0x3af   : > { %1335 = vadd.xlane.f32.xlu1 %v4372_v46  ;;  %v1367_v3 = vmul.f32 %v4375_v0, %v4375_v0 }
 0x3b0   : > { %1333 = vadd.xlane.f32.xlu0 %v4375_v0 }
 0x3b3   : > { %1399 = vadd.xlane.f32.xlu1 %v1368_v18 }
 0x3b4   : > { %1397 = vadd.xlane.f32.xlu0 %v1367_v3 }
 0x404   : > { %v1308_v28 = vpop.xlane.xlu1 %1307 }
 0x405   : > { %v1338_v13 = vmul.f32 0.0078125, %v1308_v28  ;;  %v1306_v58 = vpop.xlane.xlu0 %1305 }
 0x406   : > { %v1337_v14 = vmul.f32 0.0078125, %v1306_v58 }
 0x407   : > { %v1418_v49 = vmul.f32 %v1338_v13, %v1338_v13  ;;  %v1450_v5 = vsub.f32 %v4274_v57, %v1338_v13 }
 0x408   : > { %v1372_v21 = vpop.xlane.xlu1 %1371  ;;  %v1417_v33 = vmul.f32 %v1337_v14, %v1337_v14  ;;  %v1449_v27 = vsub.f32 %v4277_v43, %v1337_v14 }
 0x409   : > { %v1402_v54 = vmul.f32 0.0078125, %v1372_v21  ;;  %v1370_v40 = vpop.xlane.xlu0 %1369 }
 0x40a   : > { %v1401_v39 = vmul.f32 0.0078125, %v1370_v40 }
 0x40b   : > { %v1434_v44 = vsub.f32 %v1402_v54, %v1418_v49 }
 0x40c   : > { %v1433_v20 = vsub.f32 %v1401_v39, %v1417_v33  ;;  %v1312_v26 = vpop.xlane.xlu1 %1311 }
 0x40d   : > { %v1466_v52 = vadd.f32 1e-05, %v1434_v44  ;;  %v4383_v15 = vmul.f32 0.0078125, %v1312_v26  ;;  %v1310_v22 = vpop.xlane.xlu0 %1309 }
 0x40e   : > { %v1465_v56 = vadd.f32 1e-05, %v1433_v20  ;;  %v4385_v51 = vmul.f32 0.0078125, %v1310_v22 }
 0x40f   : > { %3571 = vrsqrt.f32 %v1466_v52  ;;  %v1420_v16 = vmul.f32 %v4383_v15, %v4383_v15  ;;  %v1452_v44 = vsub.f32 %v4288_v62, %v4383_v15 }
 0x410   : > { %3573 = vrsqrt.f32 %v1465_v56  ;;  %v1376_v59 = vpop.xlane.xlu1 %1375  ;;  %v1419_v32 = vmul.f32 %v4385_v51, %v4385_v51 }
 0x411   : > { %v1404_v45 = vmul.f32 0.0078125, %v1376_v59  ;;  %v1374_v11 = vpop.xlane.xlu0 %1373 }
 0x412   : > { %v1403_v25 = vmul.f32 0.0078125, %v1374_v11 }
 0x413   : > { %v1436_v34 = vsub.f32 %v1404_v45, %v1420_v16 }
 0x414   : > { %v1435_v17 = vsub.f32 %v1403_v25, %v1419_v32  ;;  %v1316_v36 = vpop.xlane.xlu1 %1315  ;;  %v1451_v32 = vsub.f32 %v4291_v61, %v4385_v51 }
 0x415   : > { %v1468_v30 = vadd.f32 1e-05, %v1436_v34  ;;  %v4391_v55 = vmul.f32 0.0078125, %v1316_v36  ;;  %v1314_v19 = vpop.xlane.xlu0 %1313 }
 0x416   : > { %v1467_v23 = vadd.f32 1e-05, %v1435_v17  ;;  %v4393_v37 = vmul.f32 0.0078125, %v1314_v19 }
 0x417   : > { %3575 = vrsqrt.f32 %v1468_v30  ;;  %v1422_v35 = vmul.f32 %v4391_v55, %v4391_v55 }
 0x418   : > { %3577 = vrsqrt.f32 %v1467_v23  ;;  %v1380_v2 = vpop.xlane.xlu1 %1379  ;;  %v1421_v9 = vmul.f32 %v4393_v37, %v4393_v37 }
 0x419   : > { %v3572_v1 = vpop.eup %3571  ;;  %v1406_v42 = vmul.f32 0.0078125, %v1380_v2  ;;  %v1378_v41 = vpop.xlane.xlu0 %1377 }
 0x41a   : > { %v3574_v38 = vpop.eup %3573  ;;  %v1502_v63 = vmul.f32 %v3572_v1, %v4398_v31  ;;  %v1405_v12 = vmul.f32 0.0078125, %v1378_v41  ;;  %v1454_v41 = vsub.f32 %v4302_v6, %v4391_v55 }
 0x41b   : > { %v1438_v4 = vsub.f32 %v1406_v42, %v1422_v35  ;;  %v1501_v18 = vmul.f32 %v3574_v38, %v4398_v31 }
 0x41c   : > { %v1437_v3 = vsub.f32 %v1405_v12, %v1421_v9  ;;  %v1320_v28 = vpop.xlane.xlu1 %1319  ;;  %v1518_v58 = vmul.f32 %v1502_v63, %v1450_v5 }
 0x41d   : > { %v1470_v57 = vadd.f32 1e-05, %v1438_v4  ;;  %v4413_v13 = vmul.f32 0.0078125, %v1320_v28  ;;  %v1318_v21 = vpop.xlane.xlu0 %1317  ;;  %v1517_v49 = vmul.f32 %v1501_v18, %v1449_v27  ;;  %v1453_v28 = vsub.f32 %v4305_v7, %v4393_v37 }
 0x41e   : > { %v1469_v54 = vadd.f32 1e-05, %v1437_v3  ;;  %v4415_v40 = vmul.f32 0.0078125, %v1318_v21  ;;  %v1538_v43 = vadd.f32 %v4410_v50, %v1518_v58 }
 0x41f   : > { %3579 = vrsqrt.f32 %v1470_v57  ;;  %v1537_v14 = vadd.f32 %v4410_v50, %v1517_v49  ;;  %v1424_v20 = vmul.f32 %v4413_v13, %v4413_v13 }
 0x420   : > { %3581 = vrsqrt.f32 %v1469_v54  ;;  %v1384_v33 = vpop.xlane.xlu1 %1383  ;;  %v1423_v59 = vmul.f32 %v4415_v40, %v4415_v40  ;;  %v1554_v45 = vmax.f32 %v1538_v43, 0.0 }
 0x421   : > { %v3576_v39 = vpop.eup %3575  ;;  %v1408_v26 = vmul.f32 0.0078125, %v1384_v33  ;;  %v1382_v52 = vpop.xlane.xlu0 %1381  ;;  %v1553_v22 = vmax.f32 %v1537_v14, 0.0 }
 0x422   : > { %v3578_v56 = vpop.eup %3577  ;;  %v1407_v16 = vmul.f32 0.0078125, %v1382_v52  ;;  %v1504_v11 = vmul.f32 %v3576_v39, %v4398_v31 }
 0x423   : > { %v1440_v25 = vsub.f32 %v1408_v26, %v1424_v20  ;;  %3140 = vmatprep.mubr.f32.mxu1 %v1553_v22  ;;  %v1503_v62 = vmul.f32 %v3578_v56, %v4398_v31  ;;  %v1456_v26 = vsub.f32 %v4316_v24, %v4413_v13 }
 0x424   : > { %v1439_v15 = vsub.f32 %v1407_v16, %v1423_v59  ;;  %v1324_v34 = vpop.xlane.xlu1 %1323  ;;  %3141 = vmatmul.mubr.f32.vlgmr.msra.gmra.mrb[32].mxu1 %v1554_v45  ;;  %v1520_v17 = vmul.f32 %v1504_v11, %v1452_v44 }
 0x425   : > { %v1472_v36 = vadd.f32 1e-05, %v1440_v25  ;;  %v4429_v30 = vmul.f32 0.0078125, %v1324_v34  ;;  %v1322_v19 = vpop.xlane.xlu0 %1321  ;;  %v1519_v23 = vmul.f32 %v1503_v62, %v1451_v32  ;;  %v1455_v62 = vsub.f32 %v4319_v53, %v4415_v40 }
 0x426   : > { %v1471_v2 = vadd.f32 1e-05, %v1439_v15  ;;  %v4431_v1 = vmul.f32 0.0078125, %v1322_v19  ;;  %v1540_v35 = vadd.f32 %v4410_v50, %v1520_v17 }
 0x427   : > { %3583 = vrsqrt.f32 %v1472_v36  ;;  %v1539_v61 = vadd.f32 %v4410_v50, %v1519_v23  ;;  %v1426_v38 = vmul.f32 %v4429_v30, %v4429_v30 }
 0x428   : > { %3585 = vrsqrt.f32 %v1471_v2  ;;  %v1388_v51 = vpop.xlane.xlu1 %1387  ;;  %v1425_v27 = vmul.f32 %v4431_v1, %v4431_v1  ;;  %v1556_v18 = vmax.f32 %v1540_v35, 0.0 }
 0x429   : > { %v3580_v42 = vpop.eup %3579  ;;  %v1410_v5 = vmul.f32 0.0078125, %v1388_v51  ;;  %v1386_v63 = vpop.xlane.xlu0 %1385  ;;  %v1555_v9 = vmax.f32 %v1539_v61, 0.0 }
 0x42a   : > { %v3582_v12 = vpop.eup %3581  ;;  %v1409_v4 = vmul.f32 0.0078125, %v1386_v63  ;;  %v1506_v3 = vmul.f32 %v3580_v42, %v4398_v31 }
 0x42b   : > { %v1442_v58 = vsub.f32 %v1410_v5, %v1426_v38  ;;  %3143 = vmatprep.mubr.f32.mxu1 %v1555_v9  ;;  %v1505_v6 = vmul.f32 %v3582_v12, %v4398_v31 }
 0x42c   : > { %v1441_v55 = vsub.f32 %v1409_v4, %v1425_v27  ;;  %v1328_v57 = vpop.xlane.xlu1 %1327  ;;  %3144 = vmatmul.mubr.f32.gmra.mrb[34].mxu1 %v1556_v18  ;;  %v1522_v21 = vmul.f32 %v1506_v3, %v1454_v41  ;;  %v1458_v41 = vsub.f32 %v4330_v47, %v4429_v30 }
 0x42d   : > { %v1474_v49 = vadd.f32 1e-05, %v1442_v58  ;;  %v4445_v54 = vmul.f32 0.0078125, %v1328_v57  ;;  %v1326_v43 = vpop.xlane.xlu0 %1325  ;;  %v1521_v14 = vmul.f32 %v1505_v6, %v1453_v28  ;;  %v1457_v28 = vsub.f32 %v4333_v48, %v4431_v1 }
 0x42e   : > { %v1473_v33 = vadd.f32 1e-05, %v1441_v55  ;;  %v4447_v39 = vmul.f32 0.0078125, %v1326_v43  ;;  %v1542_v44 = vadd.f32 %v4410_v50, %v1522_v21 }
 0x42f   : > { %3587 = vrsqrt.f32 %v1474_v49  ;;  %v1541_v7 = vadd.f32 %v4410_v50, %v1521_v14  ;;  %v1428_v52 = vmul.f32 %v4445_v54, %v4445_v54 }
 0x430   : > { %3589 = vrsqrt.f32 %v1473_v33  ;;  %v1392_v37 = vpop.xlane.xlu1 %1391  ;;  %v1427_v45 = vmul.f32 %v4447_v39, %v4447_v39  ;;  %v1558_v32 = vmax.f32 %v1542_v44, 0.0 }
 0x431   : > { %v3584_v20 = vpop.eup %3583  ;;  %v1412_v22 = vmul.f32 0.0078125, %v1392_v37  ;;  %v1390_v56 = vpop.xlane.xlu0 %1389  ;;  %v1557_v59 = vmax.f32 %v1541_v7, 0.0  ;;  %v1460_v37 = vsub.f32 %v4344_v60, %v4445_v54 }
 0x432   : > { %v3586_v16 = vpop.eup %3585  ;;  %v1411_v11 = vmul.f32 0.0078125, %v1390_v56  ;;  %v1508_v25 = vmul.f32 %v3584_v20, %v4398_v31 }
 0x433   : > { %v1444_v15 = vsub.f32 %v1412_v22, %v1428_v52  ;;  %3146 = vmatprep.mubr.f32.mxu1 %v1557_v59  ;;  %v1507_v24 = vmul.f32 %v3586_v16, %v4398_v31 }
 0x434   : > { %v1443_v13 = vsub.f32 %v1411_v11, %v1427_v45  ;;  %v1332_v34 = vpop.xlane.xlu1 %1331  ;;  %3147 = vmatmul.mubr.f32.gmra.mrb[36].mxu1 %v1558_v32  ;;  %v1524_v17 = vmul.f32 %v1508_v25, %v1456_v26  ;;  %v1459_v32 = vsub.f32 %v4347_v29, %v4447_v39 }
 0x435   : > { %v1476_v36 = vadd.f32 1e-05, %v1444_v15  ;;  %v4461_v19 = vmul.f32 0.0078125, %v1332_v34  ;;  %v1330_v23 = vpop.xlane.xlu0 %1329  ;;  %v1523_v2 = vmul.f32 %v1507_v24, %v1455_v62 }
 0x436   : > { %v1475_v35 = vadd.f32 1e-05, %v1443_v13  ;;  %v4463_v61 = vmul.f32 0.0078125, %v1330_v23  ;;  %v1544_v51 = vadd.f32 %v4410_v50, %v1524_v17 }
 0x437   : > { %3591 = vrsqrt.f32 %v1476_v36  ;;  %v1543_v53 = vadd.f32 %v4410_v50, %v1523_v2  ;;  %v1430_v38 = vmul.f32 %v4461_v19, %v4461_v19  ;;  %v1462_v29 = vsub.f32 %v4358_v8, %v4461_v19 }
 0x438   : > { %3593 = vrsqrt.f32 %v1475_v35  ;;  %v1396_v40 = vpop.xlane.xlu1 %1395  ;;  %v1429_v27 = vmul.f32 %v4463_v61, %v4463_v61  ;;  %v1560_v18 = vmax.f32 %v1544_v51, 0.0  ;;  %v1461_v51 = vsub.f32 %v4361_v10, %v4463_v61 }
 0x439   : > { %v3588_v42 = vpop.eup %3587  ;;  %v1414_v5 = vmul.f32 0.0078125, %v1396_v40  ;;  %v1394_v63 = vpop.xlane.xlu0 %1393  ;;  %v1559_v9 = vmax.f32 %v1543_v53, 0.0 }
 0x43a   : > { %v3590_v12 = vpop.eup %3589  ;;  %v1413_v4 = vmul.f32 0.0078125, %v1394_v63  ;;  %v1510_v3 = vmul.f32 %v3588_v42, %v4398_v31 }
 0x43b   : > { %v1446_v58 = vsub.f32 %v1414_v5, %v1430_v38  ;;  %3149 = vmatprep.mubr.f32.mxu1 %v1559_v9  ;;  %v1509_v47 = vmul.f32 %v3590_v12, %v4398_v31 }
 0x43c   : > { %v1445_v30 = vsub.f32 %v1413_v4, %v1429_v27  ;;  %v1336_v6 = vpop.xlane.xlu1 %1335  ;;  %3150 = vmatmul.mubr.f32.gmra.mrb[38].mxu1 %v1560_v18  ;;  %v1526_v55 = vmul.f32 %v1510_v3, %v1458_v41 }
 0x43d   : > { %v1478_v57 = vadd.f32 1e-05, %v1446_v58  ;;  %v1352_v21 = vmul.f32 0.0078125, %v1336_v6  ;;  %v1334_v49 = vpop.xlane.xlu0 %1333  ;;  %v1525_v43 = vmul.f32 %v1509_v47, %v1457_v28  ;;  %v2007_v47 = vld [vmem:[#allocation2 + $0x188] sm:$0xff] }
 0x43e   : > { %v1477_v14 = vadd.f32 1e-05, %v1445_v30  ;;  %v1351_v33 = vmul.f32 0.0078125, %v1334_v49  ;;  %v1546_v44 = vadd.f32 %v4410_v50, %v1526_v55 }
 0x43f   : > { %3595 = vrsqrt.f32 %v1478_v57  ;;  %v1545_v7 = vadd.f32 %v4410_v50, %v1525_v43  ;;  %v1432_v20 = vmul.f32 %v1352_v21, %v1352_v21  ;;  %v1464_v8 = vsub.f32 %v4372_v46, %v1352_v21  ;;  %v2006_v46 = vld [vmem:[#allocation2 + $0x180] sm:$0xff] }
 0x440   : > { %3597 = vrsqrt.f32 %v1477_v14  ;;  %v1400_v48 = vpop.xlane.xlu1 %1399  ;;  %v1431_v59 = vmul.f32 %v1351_v33, %v1351_v33  ;;  %v1562_v45 = vmax.f32 %v1546_v44, 0.0  ;;  %v1463_v10 = vsub.f32 %v4375_v0, %v1351_v33  ;;  %v4504_v0 = vld [vmem:[%s5066_s3 + $0x7] ss:$0 sm:$0xff] }
 0x441   : > { %v3592_v1 = vpop.eup %3591  ;;  %v1416_v26 = vmul.f32 0.0078125, %v1400_v48  ;;  %v1398_v52 = vpop.xlane.xlu0 %1397  ;;  %v1561_v22 = vmax.f32 %v1545_v7, 0.0  ;;  %v3388_v30 = vpack.c.bf16 %v2007_v47, %v2006_v46 }
 0x442   : > { %v3594_v56 = vpop.eup %3593  ;;  %v1415_v16 = vmul.f32 0.0078125, %v1398_v52  ;;  %v1512_v11 = vmul.f32 %v3592_v1, %v4398_v31 }
 0x443   : > { %v1448_v25 = vsub.f32 %v1416_v26, %v1432_v20  ;;  %3152 = vmatprep.mubr.f32.mxu1 %v1561_v22  ;;  %v1511_v62 = vmul.f32 %v3594_v56, %v4398_v31  ;;  %3389 = vmatprep.subr.bf16.mxu1 %v3388_v30  ;;  %v2008_v20 = vld [vmem:[#allocation2 + $0x190] sm:$0xff]  ;;  %v2009_v26 = vld [vmem:[#allocation2 + $0x198] sm:$0xff] }
 0x444   : > { %v1447_v15 = vsub.f32 %v1415_v16, %v1431_v59  ;;  %3153 = vmatmul.mubr.f32.gmra.mrb[40].mxu1 %v1562_v45  ;;  %v1528_v60 = vmul.f32 %v1512_v11, %v1460_v37  ;;  %v3392_v22 = vpack.c.bf16 %v2009_v26, %v2008_v20  ;;  %v2010_v59 = vld [vmem:[#allocation2 + $0x1a0] sm:$0xff]  ;;  %v2011_v16 = vld [vmem:[#allocation2 + $0x1a8] sm:$0xff] }
 0x445   : > { %v1480_v54 = vadd.f32 1e-05, %v1448_v25  ;;  %v1527_v24 = vmul.f32 %v1511_v62, %v1459_v32  ;;  %3391 = vmatpush3.bf16.msra.mxu1 %v3388_v30  ;;  %v3396_v11 = vpack.c.bf16 %v2011_v16, %v2010_v59 }
 0x446   : > { %v1479_v13 = vadd.f32 1e-05, %v1447_v15  ;;  %v1548_v34 = vadd.f32 %v4410_v50, %v1528_v60  ;;  %3393 = vmatprep.subr.bf16.mxu1 %v3392_v22  ;;  %v2012_v15 = vld [vmem:[#allocation2 + $0x1b0] sm:$0xff]  ;;  %v2013_v60 = vld [vmem:[#allocation2 + $0x1b8] sm:$0xff] }
 0x447   : > { %3599 = vrsqrt.f32 %v1480_v54  ;;  %v1547_v17 = vadd.f32 %v4410_v50, %v1527_v24  ;;  %v3400_v24 = vpack.c.bf16 %v2013_v60, %v2012_v15 }
 0x448   : > { %3601 = vrsqrt.f32 %v1479_v13  ;;  %v1564_v39 = vmax.f32 %v1548_v34, 0.0  ;;  %v2014_v34 = vld [vmem:[#allocation2 + $0x1c0] sm:$0xff] }
 0x449   : > { %v3596_v36 = vpop.eup %3595  ;;  %v1563_v23 = vmax.f32 %v1547_v17, 0.0  ;;  %3395 = vmatpush3.bf16.msra.mxu1 %v3392_v22  ;;  %v2015_v17 = vld [vmem:[#allocation2 + $0x1c8] sm:$0xff] }
 0x44a   : > { %v3598_v2 = vpop.eup %3597  ;;  %v1514_v35 = vmul.f32 %v3596_v36, %v4398_v31  ;;  %3397 = vmatprep.subr.bf16.mxu1 %v3396_v11 }
 0x44b   : > { %3155 = vmatprep.mubr.f32.mxu1 %v1563_v23  ;;  %v1513_v53 = vmul.f32 %v3598_v2, %v4398_v31  ;;  %v3404_v23 = vpack.c.bf16 %v2015_v17, %v2014_v34 }
 0x44c   : > { %3156 = vmatmul.mubr.f32.gmra.mrb[42].mxu1 %v1564_v39  ;;  %v1530_v40 = vmul.f32 %v1514_v35, %v1462_v29  ;;  %v2016_v35 = vld [vmem:[#allocation2 + $0x1d0] sm:$0xff] }
 0x44d   : > { %v1529_v42 = vmul.f32 %v1513_v53, %v1461_v51  ;;  %3399 = vmatpush3.bf16.msra.mxu1 %v3396_v11  ;;  %v2017_v51 = vld [vmem:[#allocation2 + $0x1d8] sm:$0xff] }
 0x44e   : > { %v1550_v41 = vadd.f32 %v4410_v50, %v1530_v40  ;;  %3401 = vmatprep.subr.bf16.mxu1 %v3400_v24  ;;  %v3408_v40 = vpack.c.bf16 %v2017_v51, %v2016_v35 }
 0x44f   : > { %v1549_v38 = vadd.f32 %v4410_v50, %v1529_v42 }
 0x450   : > { %v1566_v19 = vmax.f32 %v1550_v41, 0.0  ;;  %v2018_v41 = vld [vmem:[#allocation2 + $0x1e0] sm:$0xff] }
 0x451   : > { %v3600_v5 = vpop.eup %3599  ;;  %v1565_v63 = vmax.f32 %v1549_v38, 0.0  ;;  %3403 = vmatpush3.bf16.msra.mxu1 %v3400_v24  ;;  %v2019_v38 = vld [vmem:[#allocation2 + $0x1e8] sm:$0xff] }
 0x452   : > { %v3602_v9 = vpop.eup %3601  ;;  %v1516_v12 = vmul.f32 %v3600_v5, %v4398_v31  ;;  %3405 = vmatprep.subr.bf16.mxu1 %v3404_v23 }
 0x453   : > { %3158 = vmatprep.mubr.f32.mxu1 %v1565_v63  ;;  %v1515_v61 = vmul.f32 %v3602_v9, %v4398_v31  ;;  %v3412_v63 = vpack.c.bf16 %v2019_v38, %v2018_v41 }
 0x454   : > { %3159 = vmatmul.mubr.f32.gmra.mrb[44].mxu1 %v1566_v19  ;;  %v1532_v27 = vmul.f32 %v1516_v12, %v1464_v8  ;;  %v2020_v12 = vld [vmem:[#allocation2 + $0x1f0] sm:$0xff] }
 0x455   : > { %v1531_v4 = vmul.f32 %v1515_v61, %v1463_v10  ;;  %3407 = vmatpush3.bf16.msra.mxu1 %v3404_v23  ;;  %v2021_v10 = vld [vmem:[#allocation2 + $0x1f8] sm:$0xff] }
 0x456   : > { %v1552_v18 = vadd.f32 %v4410_v50, %v1532_v27  ;;  %3409 = vmatprep.subr.bf16.mxu1 %v3408_v40  ;;  %v3416_v27 = vpack.c.bf16 %v2021_v10, %v2020_v12 }
 0x457   : > { %v1551_v3 = vadd.f32 %v4410_v50, %v1531_v4 }
 0x458   : > { %v1568_v58 = vmax.f32 %v1552_v18, 0.0 }
 0x459   : > { %v1567_v28 = vmax.f32 %v1551_v3, 0.0  ;;  %3411 = vmatpush3.bf16.msra.mxu1 %v3408_v40 }
 0x45a   : > { %3413 = vmatprep.subr.bf16.mxu1 %v3412_v63 }
 0x45b   : > { %3161 = vmatprep.mubr.f32.mxu1 %v1567_v28 }
 0x45c   : > { %3162 = vmatmul.mubr.f32.gmra.mrb[46].mxu1 %v1568_v58 }
 0x45d   : > { %3415 = vmatpush3.bf16.msra.mxu1 %v3412_v63  ;;  %v4617_v63 = vld [vmem:[%s5066_s3 + $0x8] ss:$0 sm:$0xff] }
 0x45e   : > { %3417 = vmatprep.subr.bf16.mxu1 %v3416_v27 }
 0x461   : > { %3419 = vmatpush3.bf16.msra.mxu1 %v3416_v27 }
 0x4f7   : > { %v3142_v31 = vpop.f32.mrb[32].mxu1 }
 0x4f8   : > { %v4507_v6 = vadd.f32 %v3142_v31, %v4504_v0  ;;  %v1659_v55 = vpop.f32.mrb[33].mxu1 }
 0x4f9   : > { %v4510_v50 = vadd.f32 %v4504_v0, %v1659_v55 }
 0x4fa   : > { %1740 = vadd.xlane.f32.xlu1 %v4507_v6  ;;  %v1787_v57 = vmul.f32 %v4507_v6, %v4507_v6 }
 0x4fb   : > { %1738 = vadd.xlane.f32.xlu0 %v4510_v50  ;;  %v1786_v21 = vmul.f32 %v4510_v50, %v4510_v50 }
 0x4fe   : > { %1804 = vadd.xlane.f32.xlu1 %v1787_v57 }
 0x4ff   : > { %1802 = vadd.xlane.f32.xlu0 %v1786_v21  ;;  %v3145_v49 = vpop.f32.mrb[34].mxu1 }
 0x500   : > { %v4519_v43 = vadd.f32 %v3145_v49, %v4504_v0  ;;  %v1669_v14 = vpop.f32.mrb[35].mxu1 }
 0x501   : > { %v4522_v33 = vadd.f32 %v4504_v0, %v1669_v14 }
 0x502   : > { %1744 = vadd.xlane.f32.xlu1 %v4519_v43  ;;  %v1789_v44 = vmul.f32 %v4519_v43, %v4519_v43 }
 0x503   : > { %1742 = vadd.xlane.f32.xlu0 %v4522_v33  ;;  %v1788_v7 = vmul.f32 %v4522_v33, %v4522_v33 }
 0x506   : > { %1808 = vadd.xlane.f32.xlu1 %v1789_v44 }
 0x507   : > { %1806 = vadd.xlane.f32.xlu0 %v1788_v7  ;;  %v3148_v48 = vpop.f32.mrb[36].mxu1 }
 0x508   : > { %v4531_v1 = vadd.f32 %v3148_v48, %v4504_v0  ;;  %v1679_v37 = vpop.f32.mrb[37].mxu1 }
 0x509   : > { %v4534_v52 = vadd.f32 %v4504_v0, %v1679_v37 }
 0x50a   : > { %1748 = vadd.xlane.f32.xlu1 %v4531_v1  ;;  %v1791_v56 = vmul.f32 %v4531_v1, %v4531_v1 }
 0x50b   : > { %1746 = vadd.xlane.f32.xlu0 %v4534_v52  ;;  %v1790_v45 = vmul.f32 %v4534_v52, %v4534_v52 }
 0x50e   : > { %1812 = vadd.xlane.f32.xlu1 %v1791_v56 }
 0x50f   : > { %1810 = vadd.xlane.f32.xlu0 %v1790_v45  ;;  %v3151_v32 = vpop.f32.mrb[38].mxu1 }
 0x510   : > { %v4543_v25 = vadd.f32 %v3151_v32, %v4504_v0  ;;  %v1689_v62 = vpop.f32.mrb[39].mxu1 }
 0x511   : > { %v4546_v54 = vadd.f32 %v4504_v0, %v1689_v62 }
 0x512   : > { %1752 = vadd.xlane.f32.xlu1 %v4543_v25  ;;  %v1793_v13 = vmul.f32 %v4543_v25, %v4543_v25 }
 0x513   : > { %1750 = vadd.xlane.f32.xlu0 %v4546_v54  ;;  %v1792_v36 = vmul.f32 %v4546_v54, %v4546_v54 }
 0x516   : > { %1816 = vadd.xlane.f32.xlu1 %v1793_v13 }
 0x517   : > { %1814 = vadd.xlane.f32.xlu0 %v1792_v36  ;;  %v3154_v2 = vpop.f32.mrb[40].mxu1 }
 0x518   : > { %v4555_v29 = vadd.f32 %v3154_v2, %v4504_v0  ;;  %v1699_v39 = vpop.f32.mrb[41].mxu1 }
 0x519   : > { %v4558_v53 = vadd.f32 %v4504_v0, %v1699_v39 }
 0x51a   : > { %1756 = vadd.xlane.f32.xlu1 %v4555_v29  ;;  %v1795_v42 = vmul.f32 %v4555_v29, %v4555_v29 }
 0x51b   : > { %1754 = vadd.xlane.f32.xlu0 %v4558_v53  ;;  %v1794_v5 = vmul.f32 %v4558_v53, %v4558_v53 }
 0x51e   : > { %1820 = vadd.xlane.f32.xlu1 %v1795_v42 }
 0x51f   : > { %1818 = vadd.xlane.f32.xlu0 %v1794_v5  ;;  %v3157_v9 = vpop.f32.mrb[42].mxu1 }
 0x520   : > { %v4567_v8 = vadd.f32 %v3157_v9, %v4504_v0  ;;  %v1709_v19 = vpop.f32.mrb[43].mxu1 }
 0x521   : > { %v4570_v61 = vadd.f32 %v4504_v0, %v1709_v19 }
 0x522   : > { %1760 = vadd.xlane.f32.xlu1 %v4567_v8  ;;  %v1797_v4 = vmul.f32 %v4567_v8, %v4567_v8 }
 0x523   : > { %1758 = vadd.xlane.f32.xlu0 %v4570_v61  ;;  %v1796_v18 = vmul.f32 %v4570_v61, %v4570_v61 }
 0x526   : > { %1824 = vadd.xlane.f32.xlu1 %v1797_v4 }
 0x527   : > { %1822 = vadd.xlane.f32.xlu0 %v1796_v18  ;;  %v3160_v3 = vpop.f32.mrb[44].mxu1 }
 0x528   : > { %v4579_v28 = vadd.f32 %v3160_v3, %v4504_v0  ;;  %v1719_v58 = vpop.f32.mrb[45].mxu1 }
 0x529   : > { %v4582_v46 = vadd.f32 %v4504_v0, %v1719_v58 }
 0x52a   : > { %1764 = vadd.xlane.f32.xlu1 %v4579_v28  ;;  %v1799_v47 = vmul.f32 %v4579_v28, %v4579_v28 }
 0x52b   : > { %1762 = vadd.xlane.f32.xlu0 %v4582_v46  ;;  %v1798_v30 = vmul.f32 %v4582_v46, %v4582_v46 }
 0x52e   : > { %1828 = vadd.xlane.f32.xlu1 %v1799_v47 }
 0x52f   : > { %1826 = vadd.xlane.f32.xlu0 %v1798_v30  ;;  %v3163_v31 = vpop.f32.mrb[46].mxu1 }
 0x530   : > { %v4591_v55 = vadd.f32 %v3163_v31, %v4504_v0  ;;  %v1729_v57 = vpop.f32.mrb[47].mxu1 }
 0x531   : > { %v4594_v21 = vadd.f32 %v4504_v0, %v1729_v57  ;;  %v4629_v57 = vld [vmem:[%s5066_s3 + $0x9] ss:$0 sm:$0xff] }
 0x532   : > { %1768 = vadd.xlane.f32.xlu1 %v4591_v55  ;;  %v1801_v49 = vmul.f32 %v4591_v55, %v4591_v55 }
 0x533   : > { %1766 = vadd.xlane.f32.xlu0 %v4594_v21  ;;  %v1800_v14 = vmul.f32 %v4594_v21, %v4594_v21 }
 0x536   : > { %1832 = vadd.xlane.f32.xlu1 %v1801_v49 }
 0x537   : > { %1830 = vadd.xlane.f32.xlu0 %v1800_v14 }
 0x587   : > { %v1741_v44 = vpop.xlane.xlu1 %1740 }
 0x588   : > { %v1771_v7 = vmul.f32 0.0078125, %v1741_v44  ;;  %v1739_v48 = vpop.xlane.xlu0 %1738 }
 0x589   : > { %v1770_v37 = vmul.f32 0.0078125, %v1739_v48 }
 0x58a   : > { %v1851_v26 = vmul.f32 %v1771_v7, %v1771_v7  ;;  %v1883_v18 = vsub.f32 %v4507_v6, %v1771_v7 }
 0x58b   : > { %v1805_v20 = vpop.xlane.xlu1 %1804  ;;  %v1850_v56 = vmul.f32 %v1770_v37, %v1770_v37  ;;  %v1882_v30 = vsub.f32 %v4510_v50, %v1770_v37 }
 0x58c   : > { %v1835_v0 = vmul.f32 0.0078125, %v1805_v20  ;;  %v1803_v22 = vpop.xlane.xlu0 %1802 }
 0x58d   : > { %v1834_v59 = vmul.f32 0.0078125, %v1803_v22 }
 0x58e   : > { %v1867_v16 = vsub.f32 %v1835_v0, %v1851_v26 }
 0x58f   : > { %v1866_v45 = vsub.f32 %v1834_v59, %v1850_v56  ;;  %v1745_v11 = vpop.xlane.xlu1 %1744 }
 0x590   : > { %v1899_v32 = vadd.f32 1e-05, %v1867_v16  ;;  %v4602_v62 = vmul.f32 0.0078125, %v1745_v11  ;;  %v1743_v15 = vpop.xlane.xlu0 %1742 }
 0x591   : > { %v1898_v60 = vadd.f32 1e-05, %v1866_v45  ;;  %v4604_v24 = vmul.f32 0.0078125, %v1743_v15 }
 0x592   : > { %3603 = vrsqrt.f32 %v1899_v32  ;;  %v1853_v34 = vmul.f32 %v4602_v62, %v4602_v62  ;;  %v1885_v16 = vsub.f32 %v4519_v43, %v4602_v62 }
 0x593   : > { %3605 = vrsqrt.f32 %v1898_v60  ;;  %v1809_v13 = vpop.xlane.xlu1 %1808  ;;  %v1852_v23 = vmul.f32 %v4604_v24, %v4604_v24 }
 0x594   : > { %v1837_v17 = vmul.f32 0.0078125, %v1809_v13  ;;  %v1807_v36 = vpop.xlane.xlu0 %1806 }
 0x595   : > { %v1836_v2 = vmul.f32 0.0078125, %v1807_v36 }
 0x596   : > { %v1869_v39 = vsub.f32 %v1837_v17, %v1853_v34 }
 0x597   : > { %v1868_v35 = vsub.f32 %v1836_v2, %v1852_v23  ;;  %v1749_v51 = vpop.xlane.xlu1 %1748  ;;  %v1884_v23 = vsub.f32 %v4522_v33, %v4604_v24 }
 0x598   : > { %v1901_v40 = vadd.f32 1e-05, %v1869_v39  ;;  %v4610_v42 = vmul.f32 0.0078125, %v1749_v51  ;;  %v1747_v41 = vpop.xlane.xlu0 %1746 }
 0x599   : > { %v1900_v38 = vadd.f32 1e-05, %v1868_v35  ;;  %v4612_v5 = vmul.f32 0.0078125, %v1747_v41 }
 0x59a   : > { %3607 = vrsqrt.f32 %v1901_v40  ;;  %v1855_v12 = vmul.f32 %v4610_v42, %v4610_v42 }
 0x59b   : > { %3609 = vrsqrt.f32 %v1900_v38  ;;  %v1813_v9 = vpop.xlane.xlu1 %1812  ;;  %v1854_v58 = vmul.f32 %v4612_v5, %v4612_v5 }
 0x59c   : > { %v3604_v19 = vpop.eup %3603  ;;  %v1839_v10 = vmul.f32 0.0078125, %v1813_v9  ;;  %v1811_v27 = vpop.xlane.xlu0 %1810 }
 0x59d   : > { %v3606_v4 = vpop.eup %3605  ;;  %v1935_v3 = vmul.f32 %v3604_v19, %v4617_v63  ;;  %v1838_v47 = vmul.f32 0.0078125, %v1811_v27  ;;  %v1887_v27 = vsub.f32 %v4531_v1, %v4610_v42 }
 0x59e   : > { %v1871_v31 = vsub.f32 %v1839_v10, %v1855_v12  ;;  %v1934_v49 = vmul.f32 %v3606_v4, %v4617_v63 }
 0x59f   : > { %v1870_v14 = vsub.f32 %v1838_v47, %v1854_v58  ;;  %v1753_v44 = vpop.xlane.xlu1 %1752  ;;  %v1951_v48 = vmul.f32 %v1935_v3, %v1883_v18 }
 0x5a0   : > { %v1903_v6 = vadd.f32 1e-05, %v1871_v31  ;;  %v4632_v7 = vmul.f32 0.0078125, %v1753_v44  ;;  %v1751_v20 = vpop.xlane.xlu0 %1750  ;;  %v1950_v26 = vmul.f32 %v1934_v49, %v1882_v30  ;;  %v1886_v44 = vsub.f32 %v4534_v52, %v4612_v5 }
 0x5a1   : > { %v1902_v0 = vadd.f32 1e-05, %v1870_v14  ;;  %v4634_v22 = vmul.f32 0.0078125, %v1751_v20  ;;  %v1971_v50 = vadd.f32 %v4629_v57, %v1951_v48 }
 0x5a2   : > { %3611 = vrsqrt.f32 %v1903_v6  ;;  %v1970_v37 = vadd.f32 %v4629_v57, %v1950_v26  ;;  %v1857_v45 = vmul.f32 %v4632_v7, %v4632_v7 }
 0x5a3   : > { %3613 = vrsqrt.f32 %v1902_v0  ;;  %v1817_v56 = vpop.xlane.xlu1 %1816  ;;  %v1856_v13 = vmul.f32 %v4634_v22, %v4634_v22  ;;  %v1987_v17 = vmax.f32 %v1971_v50, 0.0 }
 0x5a4   : > { %v3608_v59 = vpop.eup %3607  ;;  %v1841_v11 = vmul.f32 0.0078125, %v1817_v56  ;;  %v1815_v32 = vpop.xlane.xlu0 %1814  ;;  %v1986_v15 = vmax.f32 %v1970_v37, 0.0 }
 0x5a5   : > { %v3610_v60 = vpop.eup %3609  ;;  %v1840_v34 = vmul.f32 0.0078125, %v1815_v32  ;;  %v1937_v36 = vmul.f32 %v3608_v59, %v4617_v63 }
 0x5a6   : > { %v1873_v2 = vsub.f32 %v1841_v11, %v1857_v45  ;;  %3196 = vmatprep.mubr.f32.mxu1 %v1986_v15  ;;  %v1936_v43 = vmul.f32 %v3610_v60, %v4617_v63  ;;  %v1889_v11 = vsub.f32 %v4543_v25, %v4632_v7 }
 0x5a7   : > { %v1872_v62 = vsub.f32 %v1840_v34, %v1856_v13  ;;  %v1757_v39 = vpop.xlane.xlu1 %1756  ;;  %3197 = vmatmul.mubr.f32.vlgmr.msra.gmra.mrb[0].mxu1 %v1987_v17  ;;  %v1953_v35 = vmul.f32 %v1937_v36, %v1885_v16 }
 0x5a8   : > { %v1905_v51 = vadd.f32 1e-05, %v1873_v2  ;;  %v4648_v40 = vmul.f32 0.0078125, %v1757_v39  ;;  %v1755_v41 = vpop.xlane.xlu0 %1754  ;;  %v1952_v38 = vmul.f32 %v1936_v43, %v1884_v23  ;;  %v1888_v43 = vsub.f32 %v4546_v54, %v4634_v22 }
 0x5a9   : > { %v1904_v9 = vadd.f32 1e-05, %v1872_v62  ;;  %v4650_v19 = vmul.f32 0.0078125, %v1755_v41  ;;  %v1973_v12 = vadd.f32 %v4629_v57, %v1953_v35 }
 0x5aa   : > { %3615 = vrsqrt.f32 %v1905_v51  ;;  %v1972_v33 = vadd.f32 %v4629_v57, %v1952_v38  ;;  %v1859_v4 = vmul.f32 %v4648_v40, %v4648_v40 }
 0x5ab   : > { %3617 = vrsqrt.f32 %v1904_v9  ;;  %v1821_v24 = vpop.xlane.xlu1 %1820  ;;  %v1858_v30 = vmul.f32 %v4650_v19, %v4650_v19  ;;  %v1989_v49 = vmax.f32 %v1973_v12, 0.0 }
 0x5ac   : > { %v3612_v10 = vpop.eup %3611  ;;  %v1843_v18 = vmul.f32 0.0078125, %v1821_v24  ;;  %v1819_v3 = vpop.xlane.xlu0 %1818  ;;  %v1988_v58 = vmax.f32 %v1972_v33, 0.0 }
 0x5ad   : > { %v3614_v47 = vpop.eup %3613  ;;  %v1842_v31 = vmul.f32 0.0078125, %v1819_v3  ;;  %v1939_v14 = vmul.f32 %v3612_v10, %v4617_v63 }
 0x5ae   : > { %v1875_v48 = vsub.f32 %v1843_v18, %v1859_v4  ;;  %3199 = vmatprep.mubr.f32.mxu1 %v1988_v58  ;;  %v1938_v1 = vmul.f32 %v3614_v47, %v4617_v63 }
 0x5af   : > { %v1874_v42 = vsub.f32 %v1842_v31, %v1858_v30  ;;  %v1761_v6 = vpop.xlane.xlu1 %1760  ;;  %3200 = vmatmul.mubr.f32.gmra.mrb[2].mxu1 %v1989_v49  ;;  %v1955_v20 = vmul.f32 %v1939_v14, %v1887_v27  ;;  %v1891_v27 = vsub.f32 %v4555_v29, %v4648_v40 }
 0x5b0   : > { %v1907_v26 = vadd.f32 1e-05, %v1875_v48  ;;  %v4664_v0 = vmul.f32 0.0078125, %v1761_v6  ;;  %v1759_v50 = vpop.xlane.xlu0 %1758  ;;  %v1954_v37 = vmul.f32 %v1938_v1, %v1886_v44  ;;  %v1890_v44 = vsub.f32 %v4558_v53, %v4650_v19 }
 0x5b1   : > { %v1906_v56 = vadd.f32 1e-05, %v1874_v42  ;;  %v4666_v59 = vmul.f32 0.0078125, %v1759_v50  ;;  %v1975_v16 = vadd.f32 %v4629_v57, %v1955_v20 }
 0x5b2   : > { %3619 = vrsqrt.f32 %v1907_v26  ;;  %v1974_v52 = vadd.f32 %v4629_v57, %v1954_v37  ;;  %v1861_v32 = vmul.f32 %v4664_v0, %v4664_v0 }
 0x5b3   : > { %3621 = vrsqrt.f32 %v1906_v56  ;;  %v1825_v5 = vpop.xlane.xlu1 %1824  ;;  %v1860_v17 = vmul.f32 %v4666_v59, %v4666_v59  ;;  %v1991_v23 = vmax.f32 %v1975_v16, 0.0 }
 0x5b4   : > { %v3616_v45 = vpop.eup %3615  ;;  %v1845_v15 = vmul.f32 0.0078125, %v1825_v5  ;;  %v1823_v60 = vpop.xlane.xlu0 %1822  ;;  %v1990_v13 = vmax.f32 %v1974_v52, 0.0  ;;  %v1893_v5 = vsub.f32 %v4567_v8, %v4664_v0 }
 0x5b5   : > { %v3618_v34 = vpop.eup %3617  ;;  %v1844_v36 = vmul.f32 0.0078125, %v1823_v60  ;;  %v1941_v2 = vmul.f32 %v3616_v45, %v4617_v63 }
 0x5b6   : > { %v1877_v62 = vsub.f32 %v1845_v15, %v1861_v32  ;;  %3202 = vmatprep.mubr.f32.mxu1 %v1990_v13  ;;  %v1940_v25 = vmul.f32 %v3618_v34, %v4617_v63 }
 0x5b7   : > { %v1876_v7 = vsub.f32 %v1844_v36, %v1860_v17  ;;  %v1765_v39 = vpop.xlane.xlu1 %1764  ;;  %3203 = vmatmul.mubr.f32.gmra.mrb[4].mxu1 %v1991_v23  ;;  %v1957_v35 = vmul.f32 %v1941_v2, %v1889_v11  ;;  %v1892_v23 = vsub.f32 %v4570_v61, %v4666_v59 }
 0x5b8   : > { %v1909_v51 = vadd.f32 1e-05, %v1877_v62  ;;  %v4680_v41 = vmul.f32 0.0078125, %v1765_v39  ;;  %v1763_v38 = vpop.xlane.xlu0 %1762  ;;  %v1956_v9 = vmul.f32 %v1940_v25, %v1888_v43 }
 0x5b9   : > { %v1908_v12 = vadd.f32 1e-05, %v1876_v7  ;;  %v4682_v33 = vmul.f32 0.0078125, %v1763_v38  ;;  %v1977_v24 = vadd.f32 %v4629_v57, %v1957_v35 }
 0x5ba   : > { %3623 = vrsqrt.f32 %v1909_v51  ;;  %v1976_v54 = vadd.f32 %v4629_v57, %v1956_v9  ;;  %v1863_v4 = vmul.f32 %v4680_v41, %v4680_v41  ;;  %v1895_v61 = vsub.f32 %v4579_v28, %v4680_v41 }
 0x5bb   : > { %3625 = vrsqrt.f32 %v1908_v12  ;;  %v1829_v22 = vpop.xlane.xlu1 %1828  ;;  %v1862_v30 = vmul.f32 %v4682_v33, %v4682_v33  ;;  %v1993_v49 = vmax.f32 %v1977_v24, 0.0  ;;  %v1894_v24 = vsub.f32 %v4582_v46, %v4682_v33 }
 0x5bc   : > { %v3620_v10 = vpop.eup %3619  ;;  %v1847_v18 = vmul.f32 0.0078125, %v1829_v22  ;;  %v1827_v3 = vpop.xlane.xlu0 %1826  ;;  %v1992_v58 = vmax.f32 %v1976_v54, 0.0 }
 0x5bd   : > { %v3622_v47 = vpop.eup %3621  ;;  %v1846_v31 = vmul.f32 0.0078125, %v1827_v3  ;;  %v1943_v14 = vmul.f32 %v3620_v10, %v4617_v63 }
 0x5be   : > { %v1879_v48 = vsub.f32 %v1847_v18, %v1863_v4  ;;  %3205 = vmatprep.mubr.f32.mxu1 %v1992_v58  ;;  %v1942_v29 = vmul.f32 %v3622_v47, %v4617_v63 }
 0x5bf   : > { %v1878_v40 = vsub.f32 %v1846_v31, %v1862_v30  ;;  %v1769_v1 = vpop.xlane.xlu1 %1768  ;;  %3206 = vmatmul.mubr.f32.gmra.mrb[6].mxu1 %v1993_v49  ;;  %v1959_v42 = vmul.f32 %v1943_v14, %v1891_v27 }
 0x5c0   : > { %v1911_v6 = vadd.f32 1e-05, %v1879_v48  ;;  %v1785_v20 = vmul.f32 0.0078125, %v1769_v1  ;;  %v1767_v26 = vpop.xlane.xlu0 %1766  ;;  %v1958_v50 = vmul.f32 %v1942_v29, %v1890_v44  ;;  %v4729_v29 = vld [vmem:[%s5066_s3 + $0xa] ss:$0 sm:$0xff] }
 0x5c1   : > { %v1910_v37 = vadd.f32 1e-05, %v1878_v40  ;;  %v1784_v56 = vmul.f32 0.0078125, %v1767_v26  ;;  %v1979_v16 = vadd.f32 %v4629_v57, %v1959_v42 }
 0x5c2   : > { %3627 = vrsqrt.f32 %v1911_v6  ;;  %v1978_v52 = vadd.f32 %v4629_v57, %v1958_v50  ;;  %v1865_v45 = vmul.f32 %v1785_v20, %v1785_v20  ;;  %v1897_v28 = vsub.f32 %v4591_v55, %v1785_v20  ;;  %v2451_v55 = vld [vmem:[%s5067_s4] sm:$0xff] }
 0x5c3   : > { %3629 = vrsqrt.f32 %v1910_v37  ;;  %v1833_v53 = vpop.xlane.xlu1 %1832  ;;  %v1864_v13 = vmul.f32 %v1784_v56, %v1784_v56  ;;  %v1995_v17 = vmax.f32 %v1979_v16, 0.0  ;;  %v1896_v46 = vsub.f32 %v4594_v21, %v1784_v56  ;;  %v2452_v21 = vld [vmem:[%s5067_s4 + $0x8] sm:$0xff] }
 0x5c4   : > { %v3624_v19 = vpop.eup %3623  ;;  %v1849_v11 = vmul.f32 0.0078125, %v1833_v53  ;;  %v1831_v32 = vpop.xlane.xlu0 %1830  ;;  %v1994_v15 = vmax.f32 %v1978_v52, 0.0 }
 0x5c5   : > { %v3626_v60 = vpop.eup %3625  ;;  %v1848_v34 = vmul.f32 0.0078125, %v1831_v32  ;;  %v1945_v36 = vmul.f32 %v3624_v19, %v4617_v63 }
 0x5c6   : > { %v1881_v2 = vsub.f32 %v1849_v11, %v1865_v45  ;;  %3208 = vmatprep.mubr.f32.mxu1 %v1994_v15  ;;  %v1944_v43 = vmul.f32 %v3626_v60, %v4617_v63  ;;  %v2453_v45 = vld [vmem:[%s5067_s4 + $0x10] sm:$0xff]  ;;  %v2454_v11 = vld [vmem:[%s5067_s4 + $0x18] sm:$0xff] }
 0x5c7   : > { %v1880_v62 = vsub.f32 %v1848_v34, %v1864_v13  ;;  %3209 = vmatmul.mubr.f32.gmra.mrb[8].mxu1 %v1995_v17  ;;  %v1961_v8 = vmul.f32 %v1945_v36, %v1893_v5  ;;  %v3424_v15 = vpack.c.bf16 %v2454_v11, %v2453_v45  ;;  %v2455_v13 = vld [vmem:[%s5067_s4 + $0x20] sm:$0xff]  ;;  %v2456_v34 = vld [vmem:[%s5067_s4 + $0x28] sm:$0xff] }
 0x5c8   : > { %v1913_v0 = vadd.f32 1e-05, %v1881_v2  ;;  %v1960_v25 = vmul.f32 %v1944_v43, %v1892_v23  ;;  %v3428_v36 = vpack.c.bf16 %v2456_v34, %v2455_v13 }
 0x5c9   : > { %v1912_v7 = vadd.f32 1e-05, %v1880_v62  ;;  %v1981_v39 = vadd.f32 %v4629_v57, %v1961_v8  ;;  %v2457_v62 = vld [vmem:[%s5067_s4 + $0x30] sm:$0xff]  ;;  %v2458_v8 = vld [vmem:[%s5067_s4 + $0x38] sm:$0xff] }
 0x5ca   : > { %3631 = vrsqrt.f32 %v1913_v0  ;;  %v1980_v35 = vadd.f32 %v4629_v57, %v1960_v25  ;;  %v3432_v25 = vpack.c.bf16 %v2458_v8, %v2457_v62 }
 0x5cb   : > { %3633 = vrsqrt.f32 %v1912_v7  ;;  %v1997_v59 = vmax.f32 %v1981_v39, 0.0  ;;  %v2459_v39 = vld [vmem:[%s5067_s4 + $0x40] sm:$0xff] }
 0x5cc   : > { %v3628_v51 = vpop.eup %3627  ;;  %v1996_v38 = vmax.f32 %v1980_v35, 0.0  ;;  %v2460_v35 = vld [vmem:[%s5067_s4 + $0x48] sm:$0xff] }
 0x5cd   : > { %v3630_v9 = vpop.eup %3629  ;;  %v1947_v12 = vmul.f32 %v3628_v51, %v4617_v63 }
 0x5ce   : > { %3211 = vmatprep.mubr.f32.mxu1 %v1996_v38  ;;  %v1946_v54 = vmul.f32 %v3630_v9, %v4617_v63  ;;  %v3436_v38 = vpack.c.bf16 %v2460_v35, %v2459_v39 }
 0x5cf   : > { %3212 = vmatmul.mubr.f32.gmra.mrb[10].mxu1 %v1997_v59  ;;  %v1963_v22 = vmul.f32 %v1947_v12, %v1895_v61  ;;  %v2461_v12 = vld [vmem:[%s5067_s4 + $0x50] sm:$0xff] }
 0x5d0   : > { %v1962_v10 = vmul.f32 %v1946_v54, %v1894_v24  ;;  %v2462_v24 = vld [vmem:[%s5067_s4 + $0x58] sm:$0xff] }
 0x5d1   : > { %v1983_v27 = vadd.f32 %v4629_v57, %v1963_v22  ;;  %v3440_v22 = vpack.c.bf16 %v2462_v24, %v2461_v12 }
 0x5d2   : > { %v1982_v4 = vadd.f32 %v4629_v57, %v1962_v10 }
 0x5d3   : > { %v1999_v41 = vmax.f32 %v1983_v27, 0.0  ;;  %v2463_v27 = vld [vmem:[%s5067_s4 + $0x60] sm:$0xff] }
 0x5d4   : > { %v3632_v18 = vpop.eup %3631  ;;  %v1998_v3 = vmax.f32 %v1982_v4, 0.0  ;;  %v2464_v4 = vld [vmem:[%s5067_s4 + $0x68] sm:$0xff] }
 0x5d5   : > { %v3634_v58 = vpop.eup %3633  ;;  %v1949_v47 = vmul.f32 %v3632_v18, %v4617_v63 }
 0x5d6   : > { %3214 = vmatprep.mubr.f32.mxu1 %v1998_v3  ;;  %v1948_v33 = vmul.f32 %v3634_v58, %v4617_v63  ;;  %v3420_v63 = vpack.c.bf16 %v2452_v21, %v2451_v55  ;;  %v3444_v3 = vpack.c.bf16 %v2464_v4, %v2463_v27 }
 0x5d7   : > { %3215 = vmatmul.mubr.f32.gmra.mrb[12].mxu1 %v1999_v41  ;;  %v1965_v30 = vmul.f32 %v1949_v47, %v1897_v28  ;;  %v2465_v47 = vld [vmem:[%s5067_s4 + $0x70] sm:$0xff] }
 0x5d8   : > { %v1964_v31 = vmul.f32 %v1948_v33, %v1896_v46  ;;  %3421 = vmatprep.subr.bf16.mxu0 %v3420_v63  ;;  %v2466_v46 = vld [vmem:[%s5067_s4 + $0x78] sm:$0xff] }
 0x5d9   : > { %v1985_v49 = vadd.f32 %v4629_v57, %v1965_v30  ;;  %3423 = vmatpush3.bf16.msra.mxu0 %v3420_v63  ;;  %v3448_v30 = vpack.c.bf16 %v2466_v46, %v2465_v47 }
 0x5da   : > { %v1984_v14 = vadd.f32 %v4629_v57, %v1964_v31  ;;  %3425 = vmatprep.subr.bf16.mxu0 %v3424_v15 }
 0x5db   : > { %v2001_v48 = vmax.f32 %v1985_v49, 0.0 }
 0x5dc   : > { %v2000_v44 = vmax.f32 %v1984_v14, 0.0 }
 0x5dd   : > { %3427 = vmatpush3.bf16.msra.mxu0 %v3424_v15 }
 0x5de   : > { %3217 = vmatprep.mubr.f32.mxu1 %v2000_v44  ;;  %3429 = vmatprep.subr.bf16.mxu0 %v3428_v36 }
 0x5df   : > { %3218 = vmatmul.mubr.f32.gmra.mrb[14].mxu1 %v2001_v48 }
 0x5e1   : > { %3431 = vmatpush3.bf16.msra.mxu0 %v3428_v36 }
 0x5e2   : > { %3433 = vmatprep.subr.bf16.mxu0 %v3432_v25 }
 0x5e5   : > { %3435 = vmatpush3.bf16.msra.mxu0 %v3432_v25 }
 0x5e6   : > { %3437 = vmatprep.subr.bf16.mxu0 %v3436_v38 }
 0x5e9   : > { %3439 = vmatpush3.bf16.msra.mxu0 %v3436_v38 }
 0x5ea   : > { %3441 = vmatprep.subr.bf16.mxu0 %v3440_v22 }
 0x5ed   : > { %3443 = vmatpush3.bf16.msra.mxu0 %v3440_v22 }
 0x5ee   : > { %3445 = vmatprep.subr.bf16.mxu0 %v3444_v3 }
 0x5f1   : > { %3447 = vmatpush3.bf16.msra.mxu0 %v3444_v3  ;;  %v4884_v3 = vld [vmem:[%s5066_s3 + $0xb] ss:$0 sm:$0xff] }
 0x5f2   : > { %3449 = vmatprep.subr.bf16.mxu0 %v3448_v30 }
 0x5f5   : > { %3451 = vmatpush3.bf16.msra.mxu0 %v3448_v30 }
 0x67a   : > { %v3198_v57 = vpop.f32.mrb[0].mxu1 }
 0x67b   : > { %v4732_v40 = vadd.f32 %v3198_v57, %v4729_v29  ;;  %v2092_v1 = vpop.f32.mrb[1].mxu1 }
 0x67c   : > { %v4735_v42 = vadd.f32 %v4729_v29, %v2092_v1 }
 0x67d   : > { %2189 = vadd.xlane.f32.xlu1 %v4732_v40  ;;  %v2236_v6 = vmul.f32 %v4732_v40, %v4732_v40 }
 0x67e   : > { %2187 = vadd.xlane.f32.xlu0 %v4735_v42  ;;  %v2235_v20 = vmul.f32 %v4735_v42, %v4735_v42 }
 0x681   : > { %2253 = vadd.xlane.f32.xlu1 %v2236_v6 }
 0x682   : > { %2251 = vadd.xlane.f32.xlu0 %v2235_v20  ;;  %v3201_v26 = vpop.f32.mrb[2].mxu1 }
 0x683   : > { %v4744_v50 = vadd.f32 %v3201_v26, %v4729_v29  ;;  %v2102_v37 = vpop.f32.mrb[3].mxu1 }
 0x684   : > { %v4747_v56 = vadd.f32 %v4729_v29, %v2102_v37 }
 0x685   : > { %2193 = vadd.xlane.f32.xlu1 %v4744_v50  ;;  %v2238_v16 = vmul.f32 %v4744_v50, %v4744_v50 }
 0x686   : > { %2191 = vadd.xlane.f32.xlu0 %v4747_v56  ;;  %v2237_v52 = vmul.f32 %v4747_v56, %v4747_v56 }
 0x689   : > { %2257 = vadd.xlane.f32.xlu1 %v2238_v16 }
 0x68a   : > { %2255 = vadd.xlane.f32.xlu0 %v2237_v52  ;;  %v3204_v53 = vpop.f32.mrb[4].mxu1 }
 0x68b   : > { %v4756_v19 = vadd.f32 %v3204_v53, %v4729_v29  ;;  %v2112_v5 = vpop.f32.mrb[5].mxu1 }
 0x68c   : > { %v4765_v32 = vadd.f32 %v4729_v29, %v2112_v5 }
 0x68d   : > { %2197 = vadd.xlane.f32.xlu1 %v4756_v19  ;;  %v2240_v60 = vmul.f32 %v4756_v19, %v4756_v19 }
 0x68e   : > { %2195 = vadd.xlane.f32.xlu0 %v4765_v32  ;;  %v2239_v17 = vmul.f32 %v4765_v32, %v4765_v32 }
 0x691   : > { %2261 = vadd.xlane.f32.xlu1 %v2240_v60 }
 0x692   : > { %2259 = vadd.xlane.f32.xlu0 %v2239_v17  ;;  %v3207_v23 = vpop.f32.mrb[6].mxu1 }
 0x693   : > { %v4780_v2 = vadd.f32 %v3207_v23, %v4729_v29  ;;  %v2122_v43 = vpop.f32.mrb[7].mxu1 }
 0x694   : > { %v4789_v0 = vadd.f32 %v4729_v29, %v2122_v43 }
 0x695   : > { %2201 = vadd.xlane.f32.xlu1 %v4780_v2  ;;  %v2242_v7 = vmul.f32 %v4780_v2, %v4780_v2 }
 0x696   : > { %2199 = vadd.xlane.f32.xlu0 %v4789_v0  ;;  %v2241_v51 = vmul.f32 %v4789_v0, %v4789_v0 }
 0x699   : > { %2265 = vadd.xlane.f32.xlu1 %v2242_v7 }
 0x69a   : > { %2263 = vadd.xlane.f32.xlu0 %v2241_v51  ;;  %v3210_v9 = vpop.f32.mrb[8].mxu1 }
 0x69b   : > { %v4804_v61 = vadd.f32 %v3210_v9, %v4729_v29  ;;  %v2132_v59 = vpop.f32.mrb[9].mxu1 }
 0x69c   : > { %v4813_v54 = vadd.f32 %v4729_v29, %v2132_v59 }
 0x69d   : > { %2205 = vadd.xlane.f32.xlu1 %v4804_v61  ;;  %v2244_v10 = vmul.f32 %v4804_v61, %v4804_v61 }
 0x69e   : > { %2203 = vadd.xlane.f32.xlu0 %v4813_v54  ;;  %v2243_v18 = vmul.f32 %v4813_v54, %v4813_v54 }
 0x6a1   : > { %2269 = vadd.xlane.f32.xlu1 %v2244_v10 }
 0x6a2   : > { %2267 = vadd.xlane.f32.xlu0 %v2243_v18  ;;  %v3213_v58 = vpop.f32.mrb[10].mxu1 }
 0x6a3   : > { %v4828_v28 = vadd.f32 %v3213_v58, %v4729_v29  ;;  %v2142_v41 = vpop.f32.mrb[11].mxu1 }
 0x6a4   : > { %v4837_v33 = vadd.f32 %v4729_v29, %v2142_v41 }
 0x6a5   : > { %2209 = vadd.xlane.f32.xlu1 %v4828_v28  ;;  %v2246_v31 = vmul.f32 %v4828_v28, %v4828_v28 }
 0x6a6   : > { %2207 = vadd.xlane.f32.xlu0 %v4837_v33  ;;  %v2245_v49 = vmul.f32 %v4837_v33, %v4837_v33 }
 0x6a9   : > { %2273 = vadd.xlane.f32.xlu1 %v2246_v31 }
 0x6aa   : > { %2271 = vadd.xlane.f32.xlu0 %v2245_v49  ;;  %v3216_v14 = vpop.f32.mrb[12].mxu1 }
 0x6ab   : > { %v4846_v44 = vadd.f32 %v3216_v14, %v4729_v29  ;;  %v2152_v48 = vpop.f32.mrb[13].mxu1 }
 0x6ac   : > { %v4849_v55 = vadd.f32 %v4729_v29, %v2152_v48 }
 0x6ad   : > { %2213 = vadd.xlane.f32.xlu1 %v4846_v44  ;;  %v2248_v21 = vmul.f32 %v4846_v44, %v4846_v44 }
 0x6ae   : > { %2211 = vadd.xlane.f32.xlu0 %v4849_v55  ;;  %v2247_v63 = vmul.f32 %v4849_v55, %v4849_v55 }
 0x6b1   : > { %2277 = vadd.xlane.f32.xlu1 %v2248_v21 }
 0x6b2   : > { %2275 = vadd.xlane.f32.xlu0 %v2247_v63  ;;  %v3219_v57 = vpop.f32.mrb[14].mxu1 }
 0x6b3   : > { %v4858_v1 = vadd.f32 %v3219_v57, %v4729_v29  ;;  %v2162_v6 = vpop.f32.mrb[15].mxu1 }
 0x6b4   : > { %v4861_v20 = vadd.f32 %v4729_v29, %v2162_v6  ;;  %v4896_v6 = vld [vmem:[%s5066_s3 + $0xc] ss:$0 sm:$0xff] }
 0x6b5   : > { %2217 = vadd.xlane.f32.xlu1 %v4858_v1  ;;  %v2250_v26 = vmul.f32 %v4858_v1, %v4858_v1 }
 0x6b6   : > { %2215 = vadd.xlane.f32.xlu0 %v4861_v20  ;;  %v2249_v37 = vmul.f32 %v4861_v20, %v4861_v20 }
 0x6b9   : > { %2281 = vadd.xlane.f32.xlu1 %v2250_v26 }
 0x6ba   : > { %2279 = vadd.xlane.f32.xlu0 %v2249_v37 }
 0x70a   : > { %v2190_v16 = vpop.xlane.xlu1 %2189 }
 0x70b   : > { %v2220_v52 = vmul.f32 0.0078125, %v2190_v16  ;;  %v2188_v53 = vpop.xlane.xlu0 %2187 }
 0x70c   : > { %v2219_v5 = vmul.f32 0.0078125, %v2188_v53 }
 0x70d   : > { %v2300_v11 = vmul.f32 %v2220_v52, %v2220_v52  ;;  %v2332_v49 = vsub.f32 %v4732_v40, %v2220_v52 }
 0x70e   : > { %v2254_v45 = vpop.xlane.xlu1 %2253  ;;  %v2299_v60 = vmul.f32 %v2219_v5, %v2219_v5  ;;  %v2331_v63 = vsub.f32 %v4735_v42, %v2219_v5 }
 0x70f   : > { %v2284_v29 = vmul.f32 0.0078125, %v2254_v45  ;;  %v2252_v15 = vpop.xlane.xlu0 %2251 }
 0x710   : > { %v2283_v13 = vmul.f32 0.0078125, %v2252_v15 }
 0x711   : > { %v2316_v34 = vsub.f32 %v2284_v29, %v2300_v11 }
 0x712   : > { %v2315_v17 = vsub.f32 %v2283_v13, %v2299_v60  ;;  %v2194_v36 = vpop.xlane.xlu1 %2193 }
 0x713   : > { %v2348_v23 = vadd.f32 1e-05, %v2316_v34  ;;  %v4869_v43 = vmul.f32 0.0078125, %v2194_v36  ;;  %v2192_v62 = vpop.xlane.xlu0 %2191 }
 0x714   : > { %v2347_v8 = vadd.f32 1e-05, %v2315_v17  ;;  %v4871_v25 = vmul.f32 0.0078125, %v2192_v62 }
 0x715   : > { %3635 = vrsqrt.f32 %v2348_v23  ;;  %v2302_v39 = vmul.f32 %v4869_v43, %v4869_v43  ;;  %v2334_v34 = vsub.f32 %v4744_v50, %v4869_v43 }
 0x716   : > { %3637 = vrsqrt.f32 %v2347_v8  ;;  %v2258_v7 = vpop.xlane.xlu1 %2257  ;;  %v2301_v38 = vmul.f32 %v4871_v25, %v4871_v25 }
 0x717   : > { %v2286_v35 = vmul.f32 0.0078125, %v2258_v7  ;;  %v2256_v51 = vpop.xlane.xlu0 %2255 }
 0x718   : > { %v2285_v9 = vmul.f32 0.0078125, %v2256_v51 }
 0x719   : > { %v2318_v59 = vsub.f32 %v2286_v35, %v2302_v39 }
 0x71a   : > { %v2317_v12 = vsub.f32 %v2285_v9, %v2301_v38  ;;  %v2198_v24 = vpop.xlane.xlu1 %2197  ;;  %v2333_v38 = vsub.f32 %v4747_v56, %v4871_v25 }
 0x71b   : > { %v2350_v22 = vadd.f32 1e-05, %v2318_v59  ;;  %v4877_v10 = vmul.f32 0.0078125, %v2198_v24  ;;  %v2196_v27 = vpop.xlane.xlu0 %2195 }
 0x71c   : > { %v2349_v4 = vadd.f32 1e-05, %v2317_v12  ;;  %v4879_v18 = vmul.f32 0.0078125, %v2196_v27 }
 0x71d   : > { %3639 = vrsqrt.f32 %v2350_v22  ;;  %v2304_v47 = vmul.f32 %v4877_v10, %v4877_v10 }
 0x71e   : > { %3641 = vrsqrt.f32 %v2349_v4  ;;  %v2262_v58 = vpop.xlane.xlu1 %2261  ;;  %v2303_v48 = vmul.f32 %v4879_v18, %v4879_v18 }
 0x71f   : > { %v3636_v41 = vpop.eup %3635  ;;  %v2288_v46 = vmul.f32 0.0078125, %v2262_v58  ;;  %v2260_v30 = vpop.xlane.xlu0 %2259 }
 0x720   : > { %v3638_v31 = vpop.eup %3637  ;;  %v2384_v14 = vmul.f32 %v3636_v41, %v4884_v3  ;;  %v2287_v21 = vmul.f32 0.0078125, %v2260_v30  ;;  %v2336_v30 = vsub.f32 %v4756_v19, %v4877_v10 }
 0x721   : > { %v2320_v57 = vsub.f32 %v2288_v46, %v2304_v47  ;;  %v2383_v26 = vmul.f32 %v3638_v31, %v4884_v3 }
 0x722   : > { %v2319_v37 = vsub.f32 %v2287_v21, %v2303_v48  ;;  %v2202_v16 = vpop.xlane.xlu1 %2201  ;;  %v2400_v53 = vmul.f32 %v2384_v14, %v2332_v49 }
 0x723   : > { %v2352_v40 = vadd.f32 1e-05, %v2320_v57  ;;  %v4899_v52 = vmul.f32 0.0078125, %v2202_v16  ;;  %v2200_v45 = vpop.xlane.xlu0 %2199  ;;  %v2399_v11 = vmul.f32 %v2383_v26, %v2331_v63  ;;  %v2335_v16 = vsub.f32 %v4765_v32, %v4879_v18 }
 0x724   : > { %v2351_v29 = vadd.f32 1e-05, %v2319_v37  ;;  %v4901_v15 = vmul.f32 0.0078125, %v2200_v45  ;;  %v2420_v42 = vadd.f32 %v4896_v6, %v2400_v53 }
 0x725   : > { %3643 = vrsqrt.f32 %v2352_v40  ;;  %v2419_v5 = vadd.f32 %v4896_v6, %v2399_v11  ;;  %v2306_v17 = vmul.f32 %v4899_v52, %v4899_v52 }
 0x726   : > { %3645 = vrsqrt.f32 %v2351_v29  ;;  %v2266_v60 = vpop.xlane.xlu1 %2265  ;;  %v2305_v7 = vmul.f32 %v4901_v15, %v4901_v15  ;;  %v2436_v35 = vmax.f32 %v2420_v42, 0.0 }
 0x727   : > { %v3640_v13 = vpop.eup %3639  ;;  %v2290_v36 = vmul.f32 0.0078125, %v2266_v60  ;;  %v2264_v23 = vpop.xlane.xlu0 %2263  ;;  %v2435_v62 = vmax.f32 %v2419_v5, 0.0 }
 0x728   : > { %v3642_v8 = vpop.eup %3641  ;;  %v2289_v39 = vmul.f32 0.0078125, %v2264_v23  ;;  %v2386_v51 = vmul.f32 %v3640_v13, %v4884_v3 }
 0x729   : > { %v2322_v9 = vsub.f32 %v2290_v36, %v2306_v17  ;;  %3252 = vmatprep.mubr.f32.mxu0 %v2435_v62  ;;  %v2385_v50 = vmul.f32 %v3642_v8, %v4884_v3  ;;  %v2338_v36 = vsub.f32 %v4780_v2, %v4899_v52 }
 0x72a   : > { %v2321_v43 = vsub.f32 %v2289_v39, %v2305_v7  ;;  %v2206_v59 = vpop.xlane.xlu1 %2205  ;;  %3253 = vmatmul.mubr.f32.vlgmr.msra.gmra.mrb[48].mxu0 %v2436_v35  ;;  %v2402_v12 = vmul.f32 %v2386_v51, %v2334_v34 }
 0x72b   : > { %v2354_v24 = vadd.f32 1e-05, %v2322_v9  ;;  %v4915_v22 = vmul.f32 0.0078125, %v2206_v59  ;;  %v2204_v27 = vpop.xlane.xlu0 %2203  ;;  %v2401_v4 = vmul.f32 %v2385_v50, %v2333_v38  ;;  %v2337_v50 = vsub.f32 %v4789_v0, %v4901_v15 }
 0x72c   : > { %v2353_v58 = vadd.f32 1e-05, %v2321_v43  ;;  %v4917_v41 = vmul.f32 0.0078125, %v2204_v27  ;;  %v2422_v47 = vadd.f32 %v4896_v6, %v2402_v12 }
 0x72d   : > { %3647 = vrsqrt.f32 %v2354_v24  ;;  %v2421_v56 = vadd.f32 %v4896_v6, %v2401_v4  ;;  %v2308_v31 = vmul.f32 %v4915_v22, %v4915_v22 }
 0x72e   : > { %3649 = vrsqrt.f32 %v2353_v58  ;;  %v2270_v25 = vpop.xlane.xlu1 %2269  ;;  %v2307_v63 = vmul.f32 %v4917_v41, %v4917_v41  ;;  %v2438_v26 = vmax.f32 %v2422_v47, 0.0 }
 0x72f   : > { %v3644_v46 = vpop.eup %3643  ;;  %v2292_v49 = vmul.f32 0.0078125, %v2270_v25  ;;  %v2268_v14 = vpop.xlane.xlu0 %2267  ;;  %v2437_v48 = vmax.f32 %v2421_v56, 0.0 }
 0x730   : > { %v3646_v21 = vpop.eup %3645  ;;  %v2291_v57 = vmul.f32 0.0078125, %v2268_v14  ;;  %v2388_v37 = vmul.f32 %v3644_v46, %v4884_v3 }
 0x731   : > { %v2324_v53 = vsub.f32 %v2292_v49, %v2308_v31  ;;  %3255 = vmatprep.mubr.f32.mxu0 %v2437_v48  ;;  %v2387_v19 = vmul.f32 %v3646_v21, %v4884_v3 }
 0x732   : > { %v2323_v10 = vsub.f32 %v2291_v57, %v2307_v63  ;;  %v2210_v40 = vpop.xlane.xlu1 %2209  ;;  %3256 = vmatmul.mubr.f32.gmra.mrb[50].mxu0 %v2438_v26  ;;  %v2404_v45 = vmul.f32 %v2388_v37, %v2336_v30  ;;  %v2340_v30 = vsub.f32 %v4804_v61, %v4915_v22 }
 0x733   : > { %v2356_v11 = vadd.f32 1e-05, %v2324_v53  ;;  %v4931_v29 = vmul.f32 0.0078125, %v2210_v40  ;;  %v2208_v42 = vpop.xlane.xlu0 %2207  ;;  %v2403_v5 = vmul.f32 %v2387_v19, %v2335_v16  ;;  %v2339_v16 = vsub.f32 %v4813_v54, %v4917_v41 }
 0x734   : > { %v2355_v60 = vadd.f32 1e-05, %v2323_v10  ;;  %v4933_v13 = vmul.f32 0.0078125, %v2208_v42  ;;  %v2424_v34 = vadd.f32 %v4896_v6, %v2404_v45 }
 0x735   : > { %3651 = vrsqrt.f32 %v2356_v11  ;;  %v2423_v32 = vadd.f32 %v4896_v6, %v2403_v5  ;;  %v2310_v23 = vmul.f32 %v4931_v29, %v4931_v29 }
 0x736   : > { %3653 = vrsqrt.f32 %v2355_v60  ;;  %v2274_v18 = vpop.xlane.xlu1 %2273  ;;  %v2309_v35 = vmul.f32 %v4933_v13, %v4933_v13  ;;  %v2440_v38 = vmax.f32 %v2424_v34, 0.0 }
 0x737   : > { %v3648_v17 = vpop.eup %3647  ;;  %v2294_v62 = vmul.f32 0.0078125, %v2274_v18  ;;  %v2272_v8 = vpop.xlane.xlu0 %2271  ;;  %v2439_v7 = vmax.f32 %v2423_v32, 0.0  ;;  %v2342_v18 = vsub.f32 %v4828_v28, %v4931_v29 }
 0x738   : > { %v3650_v39 = vpop.eup %3649  ;;  %v2293_v51 = vmul.f32 0.0078125, %v2272_v8  ;;  %v2390_v9 = vmul.f32 %v3648_v17, %v4884_v3 }
 0x739   : > { %v2326_v43 = vsub.f32 %v2294_v62, %v2310_v23  ;;  %3258 = vmatprep.mubr.f32.mxu0 %v2439_v7  ;;  %v2389_v2 = vmul.f32 %v3650_v39, %v4884_v3 }
 0x73a   : > { %v2325_v52 = vsub.f32 %v2293_v51, %v2309_v35  ;;  %v2214_v59 = vpop.xlane.xlu1 %2213  ;;  %3259 = vmatmul.mubr.f32.gmra.mrb[52].mxu0 %v2440_v38  ;;  %v2406_v12 = vmul.f32 %v2390_v9, %v2338_v36  ;;  %v2341_v38 = vsub.f32 %v4837_v33, %v4933_v13 }
 0x73b   : > { %v2358_v24 = vadd.f32 1e-05, %v2326_v43  ;;  %v4947_v27 = vmul.f32 0.0078125, %v2214_v59  ;;  %v2212_v4 = vpop.xlane.xlu0 %2211  ;;  %v2405_v58 = vmul.f32 %v2389_v2, %v2337_v50 }
 0x73c   : > { %v2357_v47 = vadd.f32 1e-05, %v2325_v52  ;;  %v4949_v56 = vmul.f32 0.0078125, %v2212_v4  ;;  %v2426_v25 = vadd.f32 %v4896_v6, %v2406_v12 }
 0x73d   : > { %3655 = vrsqrt.f32 %v2358_v24  ;;  %v2425_v0 = vadd.f32 %v4896_v6, %v2405_v58  ;;  %v2312_v31 = vmul.f32 %v4947_v27, %v4947_v27  ;;  %v2344_v33 = vsub.f32 %v4846_v44, %v4947_v27 }
 0x73e   : > { %3657 = vrsqrt.f32 %v2357_v47  ;;  %v2278_v15 = vpop.xlane.xlu1 %2277  ;;  %v2311_v63 = vmul.f32 %v4949_v56, %v4949_v56  ;;  %v2442_v26 = vmax.f32 %v2426_v25, 0.0  ;;  %v2343_v25 = vsub.f32 %v4849_v55, %v4949_v56 }
 0x73f   : > { %v3652_v46 = vpop.eup %3651  ;;  %v2296_v49 = vmul.f32 0.0078125, %v2278_v15  ;;  %v2276_v14 = vpop.xlane.xlu0 %2275  ;;  %v2441_v48 = vmax.f32 %v2425_v0, 0.0 }
 0x740   : > { %v3654_v21 = vpop.eup %3653  ;;  %v2295_v57 = vmul.f32 0.0078125, %v2276_v14  ;;  %v2392_v37 = vmul.f32 %v3652_v46, %v4884_v3 }
 0x741   : > { %v2328_v53 = vsub.f32 %v2296_v49, %v2312_v31  ;;  %3261 = vmatprep.mubr.f32.mxu0 %v2441_v48  ;;  %v2391_v61 = vmul.f32 %v3654_v21, %v4884_v3 }
 0x742   : > { %v2327_v22 = vsub.f32 %v2295_v57, %v2311_v63  ;;  %v2218_v19 = vpop.xlane.xlu1 %2217  ;;  %3262 = vmatmul.mubr.f32.gmra.mrb[54].mxu0 %v2442_v26  ;;  %v2408_v10 = vmul.f32 %v2392_v37, %v2340_v30 }
 0x743   : > { %v2360_v40 = vadd.f32 1e-05, %v2328_v53  ;;  %v2234_v45 = vmul.f32 0.0078125, %v2218_v19  ;;  %v2216_v11 = vpop.xlane.xlu0 %2215  ;;  %v2407_v42 = vmul.f32 %v2391_v61, %v2339_v16 }
 0x744   : > { %v2359_v5 = vadd.f32 1e-05, %v2327_v22  ;;  %v2233_v60 = vmul.f32 0.0078125, %v2216_v11  ;;  %v2428_v34 = vadd.f32 %v4896_v6, %v2408_v10 }
 0x745   : > { %3659 = vrsqrt.f32 %v2360_v40  ;;  %v2427_v32 = vadd.f32 %v4896_v6, %v2407_v42  ;;  %v2314_v17 = vmul.f32 %v2234_v45, %v2234_v45  ;;  %v2346_v44 = vsub.f32 %v4858_v1, %v2234_v45  ;;  %v2777_v1 = vld [vmem:[%s5068_s5] ss:$0 sm:$0xff] }
 0x746   : > { %3661 = vrsqrt.f32 %v2359_v5  ;;  %v2282_v54 = vpop.xlane.xlu1 %2281  ;;  %v2313_v7 = vmul.f32 %v2233_v60, %v2233_v60  ;;  %v2444_v35 = vmax.f32 %v2428_v34, 0.0  ;;  %v2345_v56 = vsub.f32 %v4861_v20, %v2233_v60 }
 0x747   : > { %v3656_v41 = vpop.eup %3655  ;;  %v2298_v36 = vmul.f32 0.0078125, %v2282_v54  ;;  %v2280_v23 = vpop.xlane.xlu0 %2279  ;;  %v2443_v62 = vmax.f32 %v2427_v32, 0.0 }
 0x748   : > { %v3658_v8 = vpop.eup %3657  ;;  %v2297_v39 = vmul.f32 0.0078125, %v2280_v23  ;;  %v2394_v51 = vmul.f32 %v3656_v41, %v4884_v3 }
 0x749   : > { %v2330_v9 = vsub.f32 %v2298_v36, %v2314_v17  ;;  %3264 = vmatprep.mubr.f32.mxu0 %v2443_v62  ;;  %v2393_v50 = vmul.f32 %v3658_v8, %v4884_v3 }
 0x74a   : > { %v2329_v43 = vsub.f32 %v2297_v39, %v2313_v7  ;;  %3265 = vmatmul.mubr.f32.gmra.mrb[56].mxu0 %v2444_v35  ;;  %v2410_v28 = vmul.f32 %v2394_v51, %v2342_v18 }
 0x74b   : > { %v2362_v29 = vadd.f32 1e-05, %v2330_v9  ;;  %v2409_v2 = vmul.f32 %v2393_v50, %v2341_v38 }
 0x74c   : > { %v2361_v52 = vadd.f32 1e-05, %v2329_v43  ;;  %v2430_v59 = vadd.f32 %v4896_v6, %v2410_v28 }
 0x74d   : > { %3663 = vrsqrt.f32 %v2362_v29  ;;  %v2429_v12 = vadd.f32 %v4896_v6, %v2409_v2 }
 0x74e   : > { %3665 = vrsqrt.f32 %v2361_v52  ;;  %v2446_v13 = vmax.f32 %v2430_v59, 0.0 }
 0x74f   : > { %v3660_v24 = vpop.eup %3659  ;;  %v2445_v4 = vmax.f32 %v2429_v12, 0.0 }
 0x750   : > { %v3662_v58 = vpop.eup %3661  ;;  %v2396_v47 = vmul.f32 %v3660_v24, %v4884_v3 }
 0x751   : > { %3267 = vmatprep.mubr.f32.mxu0 %v2445_v4  ;;  %v2395_v0 = vmul.f32 %v3662_v58, %v4884_v3 }
 0x752   : > { %3268 = vmatmul.mubr.f32.gmra.mrb[58].mxu0 %v2446_v13  ;;  %v2412_v15 = vmul.f32 %v2396_v47, %v2344_v33 }
 0x753   : > { %v2411_v46 = vmul.f32 %v2395_v0, %v2343_v25 }
 0x754   : > { %v2432_v30 = vadd.f32 %v4896_v6, %v2412_v15 }
 0x755   : > { %v2431_v31 = vadd.f32 %v4896_v6, %v2411_v46 }
 0x756   : > { %v2448_v27 = vmax.f32 %v2432_v30, 0.0 }
 0x757   : > { %v3664_v49 = vpop.eup %3663  ;;  %v2447_v14 = vmax.f32 %v2431_v31, 0.0 }
 0x758   : > { %v3666_v48 = vpop.eup %3665  ;;  %v2398_v55 = vmul.f32 %v3664_v49, %v4884_v3 }
 0x759   : > { %3270 = vmatprep.mubr.f32.mxu0 %v2447_v14  ;;  %v2397_v21 = vmul.f32 %v3666_v48, %v4884_v3 }
 0x75a   : > { %3271 = vmatmul.mubr.f32.gmra.mrb[60].mxu0 %v2448_v27  ;;  %v2414_v63 = vmul.f32 %v2398_v55, %v2346_v44 }
 0x75b   : > { %v2413_v57 = vmul.f32 %v2397_v21, %v2345_v56 }
 0x75c   : > { %v2434_v26 = vadd.f32 %v4896_v6, %v2414_v63 }
 0x75d   : > { %v2433_v37 = vadd.f32 %v4896_v6, %v2413_v57 }
 0x75e   : > { %v2450_v53 = vmax.f32 %v2434_v26, 0.0 }
 0x75f   : > { %v2449_v16 = vmax.f32 %v2433_v37, 0.0 }
 0x761   : > { %3273 = vmatprep.mubr.f32.mxu0 %v2449_v16 }
 0x762   : > { %3274 = vmatmul.mubr.f32.gmra.mrb[62].mxu0 %v2450_v53 }
 0x7fd   : > { %v3254_v20 = vpop.f32.mrb[48].mxu0 }
 0x7fe   : > { %v2546_v3 = vadd.f32 %v3254_v20, %v2777_v1  ;;  %v2540_v61 = vpop.f32.mrb[49].mxu0 }
 0x7ff   : > { %v2541_v22 = vadd.f32 %v2777_v1, %v2540_v61 }
 0x800   : > { %2620 = vst [vmem:[%s4993_s12 + $0x8] sm:$0xff] %v2546_v3 }
 0x801   : > { %2619 = vst [vmem:[%s4993_s12] sm:$0xff] %v2541_v22 }
 0x805   : > { %v3257_v6 = vpop.f32.mrb[50].mxu0 }
 0x806   : > { %v2556_v19 = vadd.f32 %v3257_v6, %v2777_v1  ;;  %v2550_v10 = vpop.f32.mrb[51].mxu0 }
 0x807   : > { %v2551_v40 = vadd.f32 %v2777_v1, %v2550_v10 }
 0x808   : > { %2622 = vst [vmem:[%s4993_s12 + $0x18] sm:$0xff] %v2556_v19 }
 0x809   : > { %2621 = vst [vmem:[%s4993_s12 + $0x10] sm:$0xff] %v2551_v40 }
 0x80d   : > { %v3260_v45 = vpop.f32.mrb[52].mxu0 }
 0x80e   : > { %v2566_v11 = vadd.f32 %v3260_v45, %v2777_v1  ;;  %v2560_v42 = vpop.f32.mrb[53].mxu0 }
 0x80f   : > { %v2561_v5 = vadd.f32 %v2777_v1, %v2560_v42 }
 0x810   : > { %2624 = vst [vmem:[%s4993_s12 + $0x28] sm:$0xff] %v2566_v11 }
 0x811   : > { %2623 = vst [vmem:[%s4993_s12 + $0x20] sm:$0xff] %v2561_v5 }
 0x815   : > { %v3263_v60 = vpop.f32.mrb[54].mxu0 }
 0x816   : > { %v2576_v34 = vadd.f32 %v3263_v60, %v2777_v1  ;;  %v2570_v32 = vpop.f32.mrb[55].mxu0 }
 0x817   : > { %v2571_v54 = vadd.f32 %v2777_v1, %v2570_v32 }
 0x818   : > { %2626 = vst [vmem:[%s4993_s12 + $0x38] sm:$0xff] %v2576_v34 }
 0x819   : > { %2625 = vst [vmem:[%s4993_s12 + $0x30] sm:$0xff] %v2571_v54 }
 0x81d   : > { %v3266_v41 = vpop.f32.mrb[56].mxu0 }
 0x81e   : > { %v2586_v18 = vadd.f32 %v3266_v41, %v2777_v1  ;;  %v2580_v17 = vpop.f32.mrb[57].mxu0 }
 0x81f   : > { %v2581_v36 = vadd.f32 %v2777_v1, %v2580_v17 }
 0x820   : > { %2628 = vst [vmem:[%s4993_s12 + $0x48] sm:$0xff] %v2586_v18 }
 0x821   : > { %2627 = vst [vmem:[%s4993_s12 + $0x40] sm:$0xff] %v2581_v36 }
 0x825   : > { %v3269_v23 = vpop.f32.mrb[58].mxu0 }
 0x826   : > { %v2596_v62 = vadd.f32 %v3269_v23, %v2777_v1  ;;  %v2590_v8 = vpop.f32.mrb[59].mxu0 }
 0x827   : > { %v2591_v7 = vadd.f32 %v2777_v1, %v2590_v8 }
 0x828   : > { %2630 = vst [vmem:[%s4993_s12 + $0x58] sm:$0xff] %v2596_v62 }
 0x829   : > { %2629 = vst [vmem:[%s4993_s12 + $0x50] sm:$0xff] %v2591_v7 }
 0x82d   : > { %v3272_v39 = vpop.f32.mrb[60].mxu0 }
 0x82e   : > { %v2606_v35 = vadd.f32 %v3272_v39, %v2777_v1  ;;  %v2600_v51 = vpop.f32.mrb[61].mxu0 }
 0x82f   : > { %v2601_v38 = vadd.f32 %v2777_v1, %v2600_v51 }
 0x830   : > { %2632 = vst [vmem:[%s4993_s12 + $0x68] sm:$0xff] %v2606_v35 }
 0x831   : > { %2631 = vst [vmem:[%s4993_s12 + $0x60] sm:$0xff] %v2601_v38 }
 0x835   : > { %v3275_v9 = vpop.f32.mrb[62].mxu0 }
 0x836   : > { %v2616_v50 = vadd.f32 %v3275_v9, %v2777_v1  ;;  %v2610_v43 = vpop.f32.mrb[63].mxu0 }
 0x837   : > { %v2611_v28 = vadd.f32 %v2777_v1, %v2610_v43 }
 0x838   : > { %2634 = vst [vmem:[%s4993_s12 + $0x78] sm:$0xff] %v2616_v50 }
 0x839   : > { %2633 = vst [vmem:[%s4993_s12 + $0x70] sm:$0xff] %v2611_v28 }
 0x83a   : > { %3708 = shalt.err (!%p3705_p7)
}
 0x83b   : > { %s3709_s28 = scalar_lea.hbm %s5014_s17, 2048  ;;  %s3713_s11 = scalar_lea.hbm %s5069_s6, 4096 }
 0x83c   : > { %p3710_p8 = scmp.ne.s32.totalorder %s5014_s17, %s3709_s28  ;;  %p3714_p1 = scmp.lt.u32.totalorder %s5014_s17, %s5069_s6 }
 0x83d   : > { %p3715_p0 = scmp.lt.u32.totalorder %s3713_s11, %s3709_s28  ;;  %p3717_p6 = scmp.lt.u32.totalorder %s3709_s28, %s5014_s17 }
 0x83e   : > { %p3711_p11 = pnand %p3710_p8, %p5080_p9 }
 0x83f   : > { %p3716_p5 = por %p3715_p0, %p3714_p1 }
 0x840   : > { %p3712_p13 = pneg %p3711_p11 }
 0x841   : > { %p3718_p10 = por %p3717_p6, %p3716_p5 }
 0x843   : > { %p3719_p12 = pnand %p3718_p10, %p3712_p13 }
 0x845   : > { %3722 = shalt.err (!%p3719_p12)
}
 0x846   : > { %s3768_s14 = smov 128   ;;  %s3769_s9 = smov 8  }
 0x847   : > { %3488 = dma.vmem_to_hbm [thread:$0]  (%p5080_p9), %s5016_s15, 2048, %s5014_s17, %s5022_s18, %s3768_s14, %s3768_s14, %s3769_s9  }
 0x848 PF: > { %p3500_p2 = scmp.ge.s32.totalorder %s3761_s24, 2  ;;  %s2664_s16 = sand.u32 1, %s3749_s21  }
 0x849   : > { %p5081_p3 = scmp.ne.s32.totalorder %s5074_s8, 0  ;;  %s2665_s25 = scalar_lea.sflag [#allocation4], %s2664_s16 }
 0x84b   : > { %p3495_p4 = pnand %p3500_p2, %p5081_p3 }
 0x84d   : > { %3744 = dma.done.wait (!%p3495_p4), %s2665_s25, 2048  }
 0x84e   : > { %3746 = vsyncadd (!%p3495_p4), %s2665_s25, 4294965248  ;;  %p17_p7 = scmp.ge.s32.totalorder %s3830_s27, 4   ;;  %s5082_s21 = smov %s3753_s22 }
 0x84f   : > { %s5083_s22 = smov %s3757_s23  ;;  %s5084_s23 = smov %s3841_s30 }
 0x850   : > { %s5085_s24 = smov %s3830_s27  ;;  %19 = sbr.rel (!%p17_p7) target bundleno = 4 (0x4), region = 87 }
 0x857   :  { %2670 = vsyncpa [#allocation3], 1 }
 0x858   :  { %2672 = vsyncpa [#allocation3 + $0x1], 1 }
 0x859   :  { %2673 = vsyncpa [#allocation4], 1 }
 0x85a   :  { %2675 = vsyncpa [#allocation4 + $0x1], 1 }

</bundles_post_ra>
